<compile_context>
chip_gen: v7x
topology: tpu7x:2x2x1
jax: 0.10.0
libtpu: 0.0.40
codegen_flags: <defaults>
</compile_context>

<pallas_src>
import functools

import jax
import jax.numpy as jnp
from jax.experimental import pallas as pl
from jax.experimental.pallas import tpu as pltpu


def _rcab_body_kernel(H, W, xp_ref, w1_ref, b1_ref, w2_ref, b2_ref,
                      body_ref, pool_ref, t1_pad_ref):
    # xp_ref   : (1, C, (H+2)*(W+2) + 2)  zero-padded input, flattened spatially
    # w1_ref/w2_ref : (9, C, C)  conv taps, [k] = weight[:, :, k//3, k%3]
    # b1_ref/b2_ref : (C, 1)
    # body_ref : (1, C, H*(W+2))  conv2 output in row-padded-width layout
    # pool_ref : (1, C, 1)        f32 sum of conv2 output over valid pixels
    # t1_pad_ref : VMEM (C, (H+2)*(W+2) + 2) f32 scratch (padded ReLU(conv1) output)
    Wp = W + 2
    N = H * Wp
    C = xp_ref.shape[1]

    xp = xp_ref[0]                                            # (C, Lp)

    # ---- conv1 (3x3, pad 1) + bias + ReLU --------------------------------
    acc1 = jnp.zeros((C, N), jnp.float32)
    for k in range(9):
        off = (k // 3) * Wp + (k % 3)
        acc1 += jnp.dot(w1_ref[k], xp[:, off:off + N],
                        preferred_element_type=jnp.float32)
    acc1 = jnp.maximum(acc1 + b1_ref[...], 0.0)

    # Columns w in {W, W+1} of each output row are cross-row garbage: zero them and
    # drop the result into the zero-filled padded scratch at spatial offset (1, 1).
    col = jax.lax.broadcasted_iota(jnp.int32, (C, N), 1) % Wp
    valid = col < W
    t1_pad_ref[...] = jnp.zeros_like(t1_pad_ref)
    t1_pad_ref[:, Wp + 1:Wp + 1 + N] = jnp.where(valid, acc1, 0.0)

    # ---- conv2 (3x3, pad 1) + bias ---------------------------------------
    t1 = t1_pad_ref[...]
    acc2 = jnp.zeros((C, N), jnp.float32)
    for k in range(9):
        off = (k // 3) * Wp + (k % 3)
        acc2 += jnp.dot(w2_ref[k], t1[:, off:off + N],
                        preferred_element_type=jnp.float32)
    acc2 = acc2 + b2_ref[...]

    body_ref[0] = acc2.astype(body_ref.dtype)
    # f32 pooled sums over valid pixels (f32 accumulation kept even for bf16 inputs).
    pool_ref[0] = jnp.sum(jnp.where(valid, acc2, 0.0), axis=1, keepdims=True)


def _se_kernel(inv_hw, pool_ref, w1t_ref, b1_ref, w2t_ref, b2_ref, scale_ref):
    # pool_ref: (B, C) f32 pooled sums.  w1t: (C, Cr)  b1: (1, Cr)  w2t: (Cr, C)  b2: (1, C)
    pooled = pool_ref[...] * inv_hw                           # mean over H*W, (B, C)
    h = jnp.dot(pooled, w1t_ref[...],
                preferred_element_type=jnp.float32) + b1_ref[...]
    h = jnp.maximum(h, 0.0)
    y = jnp.dot(h, w2t_ref[...],
                preferred_element_type=jnp.float32) + b2_ref[...]
    scale_ref[...] = jax.nn.sigmoid(y)                        # (B, C) f32


def _scale_residual_kernel(x_ref, body_ref, scale_ref, o_ref):
    # x_ref, body_ref, o_ref: (1, C, T) in the input dtype; scale_ref: (1, C, 1) f32.
    s = scale_ref[0].astype(x_ref.dtype)                      # (C, 1), cast once per tile
    o_ref[0] = x_ref[0] + body_ref[0] * s


def rcab_forward(x, conv1_w, conv1_b, conv2_w, conv2_b,
                 du1_w, du1_b, du2_w, du2_b):
    """RCAB forward.  x: (B, C, H, W) NCHW (PyTorch layout).

    conv1_w / conv2_w : (C, C, 3, 3) OIHW   conv1_b / conv2_b : (C,)
    du1_w : (Cr, C)  du1_b : (Cr,)   du2_w : (C, Cr)  du2_b : (C,)
    """
    B, C, H, W = x.shape
    Cr = du1_w.shape[0]
    Hp, Wp = H + 2, W + 2
    HW = H * W
    N = H * Wp                 # row-padded-width spatial size
    Lp = Hp * Wp + 2           # flat padded length (+2 so every tap slab is in range)

    # ---- pass 1: fused conv3x3 -> ReLU -> conv3x3 (+ pooled sums), per batch ----
    # TODO(synk): for production-size feature maps (e.g. C=64 @ 720p) this per-batch
    # full-image block must be row-tiled with halo DMA (memory_space=pl.ANY +
    # make_async_copy); at small patch sizes it fits VMEM comfortably.
    xp = jnp.pad(x, ((0, 0), (0, 0), (1, 1), (1, 1))).reshape(B, C, Hp * Wp)
    xp = jnp.pad(xp, ((0, 0), (0, 0), (0, 2)))                 # -> (B, C, Lp)
    w1_taps = conv1_w.transpose(2, 3, 0, 1).reshape(9, C, C)   # [k] = w[:, :, k//3, k%3]
    w2_taps = conv2_w.transpose(2, 3, 0, 1).reshape(9, C, C)
    b1 = conv1_b.reshape(C, 1)
    b2 = conv2_b.reshape(C, 1)

    body_padded, pooled = pl.pallas_call(
        functools.partial(_rcab_body_kernel, H, W),
        out_shape=(jax.ShapeDtypeStruct((B, C, N), x.dtype),
                   jax.ShapeDtypeStruct((B, C, 1), jnp.float32)),
        grid_spec=pltpu.PrefetchScalarGridSpec(
            num_scalar_prefetch=0,
            grid=(B,),
            in_specs=[
                pl.BlockSpec((1, C, Lp), lambda b: (b, 0, 0)),
                pl.BlockSpec((9, C, C), lambda b: (0, 0, 0)),
                pl.BlockSpec((C, 1), lambda b: (0, 0)),
                pl.BlockSpec((9, C, C), lambda b: (0, 0, 0)),
                pl.BlockSpec((C, 1), lambda b: (0, 0)),
            ],
            out_specs=[
                pl.BlockSpec((1, C, N), lambda b: (b, 0, 0)),
                pl.BlockSpec((1, C, 1), lambda b: (b, 0, 0)),
            ],
            scratch_shapes=[pltpu.VMEM((C, Lp), jnp.float32)],
        ),
        compiler_params=pltpu.CompilerParams(
            dimension_semantics=("parallel",)),
    )(xp, w1_taps, b1, w2_taps, b2)

    # Drop the 2 bogus columns per row (single fused XLA slice-copy).
    # TODO(synk): a row-tiled body kernel would emit the compact layout directly.
    body = body_padded.reshape(B, C, H, Wp)[:, :, :, :W].reshape(B, C, HW)

    # ---- pass 2: squeeze-excite 1x1 convs, batched over B -----------------------
    scale = pl.pallas_call(
        functools.partial(_se_kernel, 1.0 / float(HW)),
        out_shape=jax.ShapeDtypeStruct((B, C), jnp.float32),
    )(pooled.reshape(B, C), du1_w.T, du1_b.reshape(1, Cr),
      du2_w.T, du2_b.reshape(1, C))

    # ---- pass 3: streaming  out = x + body * scale  -----------------------------
    if HW % 128 == 0:
        T = min(2048, HW)      # lane-dense tiles, VMEM-safe even on v7x
    else:
        T = HW                 # TODO(synk): pad HW up to a 128 multiple to avoid masked stores
    x_flat = x.reshape(B, C, HW)
    scale3 = scale.reshape(B, C, 1)

    out_flat = pl.pallas_call(
        _scale_residual_kernel,
        out_shape=jax.ShapeDtypeStruct((B, C, HW), x.dtype),
        grid_spec=pltpu.PrefetchScalarGridSpec(
            num_scalar_prefetch=0,
            grid=(B, pl.cdiv(HW, T)),
            in_specs=[
                pl.BlockSpec((1, C, T), lambda b, t: (b, 0, t)),
                pl.BlockSpec((1, C, T), lambda b, t: (b, 0, t)),
                pl.BlockSpec((1, C, 1), lambda b, t: (b, 0, 0)),
            ],
            out_specs=pl.BlockSpec((1, C, T), lambda b, t: (b, 0, t)),
        ),
        compiler_params=pltpu.CompilerParams(
            dimension_semantics=("parallel", "parallel")),
    )(x_flat, body, scale3)

    return out_flat.reshape(B, C, H, W)


def reference_rcab(x, conv1_w, conv1_b, conv2_w, conv2_b,
                   du1_w, du1_b, du2_w, du2_b):
    dn = ('NCHW', 'OIHW', 'NCHW')
    t = jax.lax.conv_general_dilated(x, conv1_w, (1, 1), ((1, 1), (1, 1)),
                                     dimension_numbers=dn) + conv1_b[None, :, None, None]
    t = jnp.maximum(t, 0.0)
    t = jax.lax.conv_general_dilated(t, conv2_w, (1, 1), ((1, 1), (1, 1)),
                                     dimension_numbers=dn) + conv2_b[None, :, None, None]
    y = jnp.mean(t, axis=(2, 3), keepdims=True)
    y = jnp.einsum('oc,bcij->boij', du1_w, y) + du1_b[None, :, None, None]
    y = jnp.maximum(y, 0.0)
    y = jnp.einsum('oc,bcij->boij', du2_w, y) + du2_b[None, :, None, None]
    y = jax.nn.sigmoid(y)
    return x + t * y


if __name__ == "__main__":
    B, C, H, W = 2, 16, 16, 16
    reduction = 4
    Cr = C // reduction

    key = jax.random.PRNGKey(0)
    ks = jax.random.split(key, 9)

    x = jax.random.normal(ks[0], (B, C, H, W), dtype=jnp.float32)
    conv1_w = jax.random.normal(ks[1], (C, C, 3, 3), dtype=jnp.float32) * 0.05
    conv1_b = jax.random.normal(ks[2], (C,), dtype=jnp.float32) * 0.05
    conv2_w = jax.random.normal(ks[3], (C, C, 3, 3), dtype=jnp.float32) * 0.05
    conv2_b = jax.random.normal(ks[4], (C,), dtype=jnp.float32) * 0.05
    du1_w = jax.random.normal(ks[5], (Cr, C), dtype=jnp.float32) * 0.1
    du1_b = jax.random.normal(ks[6], (Cr,), dtype=jnp.float32) * 0.1
    du2_w = jax.random.normal(ks[7], (C, Cr), dtype=jnp.float32) * 0.1
    du2_b = jax.random.normal(ks[8], (C,), dtype=jnp.float32) * 0.1

    out = jax.block_until_ready(
        rcab_forward(x, conv1_w, conv1_b, conv2_w, conv2_b,
                     du1_w, du1_b, du2_w, du2_b))
    ref = reference_rcab(x, conv1_w, conv1_b, conv2_w, conv2_b,
                         du1_w, du1_b, du2_w, du2_b)

    assert out.shape == (B, C, H, W)
    rel_err = jnp.max(jnp.abs(out - ref)) / (jnp.max(jnp.abs(ref)) + 1e-6)
    assert rel_err < 2e-2, f"mismatch vs reference: rel_err={rel_err}"

    print("KERNEL_OK")
</pallas_src>

<mosaic_0001>
module attributes {stable_mosaic.version = 11 : i64} {
  func.func @_rcab_body_kernel(%arg0: i32, %arg1: memref<1x16x326xf32, #tpu.memory_space<vmem>>, %arg2: memref<9x16x16xf32, #tpu.memory_space<vmem>>, %arg3: memref<16x1xf32, #tpu.memory_space<vmem>>, %arg4: memref<9x16x16xf32, #tpu.memory_space<vmem>>, %arg5: memref<16x1xf32, #tpu.memory_space<vmem>>, %arg6: memref<1x16x288xf32, #tpu.memory_space<vmem>>, %arg7: memref<1x16x1xf32, #tpu.memory_space<vmem>>, %arg8: memref<16x326xf32, #tpu.memory_space<vmem>>) attributes {dimension_semantics = [#tpu.dimension_semantics<parallel>], iteration_bounds = array<i64: 2>, scalar_prefetch = 0 : i64, scratch_operands = 1 : i64, tpu.core_type = #tpu.core_type<tc>, window_params = [{transform_indices = @transform_0, window_bounds = array<i64: 1, 16, 326>}, {pipeline_mode = #tpu.pipeline_mode<synchronous>, transform_indices = @transform_1, window_bounds = array<i64: 9, 16, 16>}, {pipeline_mode = #tpu.pipeline_mode<synchronous>, transform_indices = @transform_2, window_bounds = array<i64: 16, 1>}, {pipeline_mode = #tpu.pipeline_mode<synchronous>, transform_indices = @transform_3, window_bounds = array<i64: 9, 16, 16>}, {pipeline_mode = #tpu.pipeline_mode<synchronous>, transform_indices = @transform_4, window_bounds = array<i64: 16, 1>}, {transform_indices = @transform_5, window_bounds = array<i64: 1, 16, 288>}, {transform_indices = @transform_6, window_bounds = array<i64: 1, 16, 1>}]} {
    %c0 = arith.constant 0 : index
    %c0_0 = arith.constant 0 : index
    %c0_1 = arith.constant 0 : index
    %0 = vector.load %arg1[%c0, %c0_0, %c0_1] : memref<1x16x326xf32, #tpu.memory_space<vmem>>, vector<1x16x326xf32>
    %1 = vector.shape_cast %0 : vector<1x16x326xf32> to vector<16x326xf32>
    %cst = arith.constant 0.000000e+00 : f32
    %2 = vector.broadcast %cst : f32 to vector<16x288xf32>
    %c0_2 = arith.constant 0 : index
    %c0_3 = arith.constant 0 : index
    %c0_4 = arith.constant 0 : index
    %3 = vector.load %arg2[%c0_2, %c0_3, %c0_4] : memref<9x16x16xf32, #tpu.memory_space<vmem>>, vector<1x16x16xf32>
    %4 = vector.shape_cast %3 : vector<1x16x16xf32> to vector<16x16xf32>
    %5 = vector.extract_strided_slice %1 {offsets = [0, 0], sizes = [16, 288], strides = [1, 1]} : vector<16x326xf32> to vector<16x288xf32>
    %cst_5 = arith.constant dense<0.000000e+00> : vector<16x288xf32>
    %6 = tpu.matmul %4, %5, %cst_5 {dimension_numbers = #tpu.dot_dimension_numbers<[1], [0], [0], [1], [0, 0, 1, 1], [], []>} : vector<16x16xf32>, vector<16x288xf32>, vector<16x288xf32> -> vector<16x288xf32>
    %7 = arith.addf %2, %6 : vector<16x288xf32>
    %c1 = arith.constant 1 : index
    %c0_6 = arith.constant 0 : index
    %c0_7 = arith.constant 0 : index
    %8 = vector.load %arg2[%c1, %c0_6, %c0_7] : memref<9x16x16xf32, #tpu.memory_space<vmem>>, vector<1x16x16xf32>
    %9 = vector.shape_cast %8 : vector<1x16x16xf32> to vector<16x16xf32>
    %10 = vector.extract_strided_slice %1 {offsets = [0, 1], sizes = [16, 288], strides = [1, 1]} : vector<16x326xf32> to vector<16x288xf32>
    %cst_8 = arith.constant dense<0.000000e+00> : vector<16x288xf32>
    %11 = tpu.matmul %9, %10, %cst_8 {dimension_numbers = #tpu.dot_dimension_numbers<[1], [0], [0], [1], [0, 0, 1, 1], [], []>} : vector<16x16xf32>, vector<16x288xf32>, vector<16x288xf32> -> vector<16x288xf32>
    %12 = arith.addf %7, %11 : vector<16x288xf32>
    %c2 = arith.constant 2 : index
    %c0_9 = arith.constant 0 : index
    %c0_10 = arith.constant 0 : index
    %13 = vector.load %arg2[%c2, %c0_9, %c0_10] : memref<9x16x16xf32, #tpu.memory_space<vmem>>, vector<1x16x16xf32>
    %14 = vector.shape_cast %13 : vector<1x16x16xf32> to vector<16x16xf32>
    %15 = vector.extract_strided_slice %1 {offsets = [0, 2], sizes = [16, 288], strides = [1, 1]} : vector<16x326xf32> to vector<16x288xf32>
    %cst_11 = arith.constant dense<0.000000e+00> : vector<16x288xf32>
    %16 = tpu.matmul %14, %15, %cst_11 {dimension_numbers = #tpu.dot_dimension_numbers<[1], [0], [0], [1], [0, 0, 1, 1], [], []>} : vector<16x16xf32>, vector<16x288xf32>, vector<16x288xf32> -> vector<16x288xf32>
    %17 = arith.addf %12, %16 : vector<16x288xf32>
    %c3 = arith.constant 3 : index
    %c0_12 = arith.constant 0 : index
    %c0_13 = arith.constant 0 : index
    %18 = vector.load %arg2[%c3, %c0_12, %c0_13] : memref<9x16x16xf32, #tpu.memory_space<vmem>>, vector<1x16x16xf32>
    %19 = vector.shape_cast %18 : vector<1x16x16xf32> to vector<16x16xf32>
    %20 = vector.extract_strided_slice %1 {offsets = [0, 18], sizes = [16, 288], strides = [1, 1]} : vector<16x326xf32> to vector<16x288xf32>
    %cst_14 = arith.constant dense<0.000000e+00> : vector<16x288xf32>
    %21 = tpu.matmul %19, %20, %cst_14 {dimension_numbers = #tpu.dot_dimension_numbers<[1], [0], [0], [1], [0, 0, 1, 1], [], []>} : vector<16x16xf32>, vector<16x288xf32>, vector<16x288xf32> -> vector<16x288xf32>
    %22 = arith.addf %17, %21 : vector<16x288xf32>
    %c4 = arith.constant 4 : index
    %c0_15 = arith.constant 0 : index
    %c0_16 = arith.constant 0 : index
    %23 = vector.load %arg2[%c4, %c0_15, %c0_16] : memref<9x16x16xf32, #tpu.memory_space<vmem>>, vector<1x16x16xf32>
    %24 = vector.shape_cast %23 : vector<1x16x16xf32> to vector<16x16xf32>
    %25 = vector.extract_strided_slice %1 {offsets = [0, 19], sizes = [16, 288], strides = [1, 1]} : vector<16x326xf32> to vector<16x288xf32>
    %cst_17 = arith.constant dense<0.000000e+00> : vector<16x288xf32>
    %26 = tpu.matmul %24, %25, %cst_17 {dimension_numbers = #tpu.dot_dimension_numbers<[1], [0], [0], [1], [0, 0, 1, 1], [], []>} : vector<16x16xf32>, vector<16x288xf32>, vector<16x288xf32> -> vector<16x288xf32>
    %27 = arith.addf %22, %26 : vector<16x288xf32>
    %c5 = arith.constant 5 : index
    %c0_18 = arith.constant 0 : index
    %c0_19 = arith.constant 0 : index
    %28 = vector.load %arg2[%c5, %c0_18, %c0_19] : memref<9x16x16xf32, #tpu.memory_space<vmem>>, vector<1x16x16xf32>
    %29 = vector.shape_cast %28 : vector<1x16x16xf32> to vector<16x16xf32>
    %30 = vector.extract_strided_slice %1 {offsets = [0, 20], sizes = [16, 288], strides = [1, 1]} : vector<16x326xf32> to vector<16x288xf32>
    %cst_20 = arith.constant dense<0.000000e+00> : vector<16x288xf32>
    %31 = tpu.matmul %29, %30, %cst_20 {dimension_numbers = #tpu.dot_dimension_numbers<[1], [0], [0], [1], [0, 0, 1, 1], [], []>} : vector<16x16xf32>, vector<16x288xf32>, vector<16x288xf32> -> vector<16x288xf32>
    %32 = arith.addf %27, %31 : vector<16x288xf32>
    %c6 = arith.constant 6 : index
    %c0_21 = arith.constant 0 : index
    %c0_22 = arith.constant 0 : index
    %33 = vector.load %arg2[%c6, %c0_21, %c0_22] : memref<9x16x16xf32, #tpu.memory_space<vmem>>, vector<1x16x16xf32>
    %34 = vector.shape_cast %33 : vector<1x16x16xf32> to vector<16x16xf32>
    %35 = vector.extract_strided_slice %1 {offsets = [0, 36], sizes = [16, 288], strides = [1, 1]} : vector<16x326xf32> to vector<16x288xf32>
    %cst_23 = arith.constant dense<0.000000e+00> : vector<16x288xf32>
    %36 = tpu.matmul %34, %35, %cst_23 {dimension_numbers = #tpu.dot_dimension_numbers<[1], [0], [0], [1], [0, 0, 1, 1], [], []>} : vector<16x16xf32>, vector<16x288xf32>, vector<16x288xf32> -> vector<16x288xf32>
    %37 = arith.addf %32, %36 : vector<16x288xf32>
    %c7 = arith.constant 7 : index
    %c0_24 = arith.constant 0 : index
    %c0_25 = arith.constant 0 : index
    %38 = vector.load %arg2[%c7, %c0_24, %c0_25] : memref<9x16x16xf32, #tpu.memory_space<vmem>>, vector<1x16x16xf32>
    %39 = vector.shape_cast %38 : vector<1x16x16xf32> to vector<16x16xf32>
    %40 = vector.extract_strided_slice %1 {offsets = [0, 37], sizes = [16, 288], strides = [1, 1]} : vector<16x326xf32> to vector<16x288xf32>
    %cst_26 = arith.constant dense<0.000000e+00> : vector<16x288xf32>
    %41 = tpu.matmul %39, %40, %cst_26 {dimension_numbers = #tpu.dot_dimension_numbers<[1], [0], [0], [1], [0, 0, 1, 1], [], []>} : vector<16x16xf32>, vector<16x288xf32>, vector<16x288xf32> -> vector<16x288xf32>
    %42 = arith.addf %37, %41 : vector<16x288xf32>
    %c8 = arith.constant 8 : index
    %c0_27 = arith.constant 0 : index
    %c0_28 = arith.constant 0 : index
    %43 = vector.load %arg2[%c8, %c0_27, %c0_28] : memref<9x16x16xf32, #tpu.memory_space<vmem>>, vector<1x16x16xf32>
    %44 = vector.shape_cast %43 : vector<1x16x16xf32> to vector<16x16xf32>
    %45 = vector.extract_strided_slice %1 {offsets = [0, 38], sizes = [16, 288], strides = [1, 1]} : vector<16x326xf32> to vector<16x288xf32>
    %cst_29 = arith.constant dense<0.000000e+00> : vector<16x288xf32>
    %46 = tpu.matmul %44, %45, %cst_29 {dimension_numbers = #tpu.dot_dimension_numbers<[1], [0], [0], [1], [0, 0, 1, 1], [], []>} : vector<16x16xf32>, vector<16x288xf32>, vector<16x288xf32> -> vector<16x288xf32>
    %47 = arith.addf %42, %46 : vector<16x288xf32>
    %c0_30 = arith.constant 0 : index
    %c0_31 = arith.constant 0 : index
    %48 = vector.load %arg3[%c0_30, %c0_31] : memref<16x1xf32, #tpu.memory_space<vmem>>, vector<16x1xf32>
    %49 = vector.broadcast %48 : vector<16x1xf32> to vector<16x288xf32>
    %50 = arith.addf %47, %49 : vector<16x288xf32>
    %cst_32 = arith.constant 0.000000e+00 : f32
    %51 = vector.broadcast %cst_32 : f32 to vector<16x288xf32>
    %52 = arith.maximumf %50, %51 : vector<16x288xf32>
    %53 = tpu.iota {dimensions = array<i32: 1>} : vector<16x288xi32>
    %c18_i32 = arith.constant 18 : i32
    %c0_i32 = arith.constant 0 : i32
    %54 = arith.cmpi eq, %c18_i32, %c0_i32 : i32
    %c1_i32 = arith.constant 1 : i32
    %55 = arith.select %54, %c1_i32, %c18_i32 : i32
    %56 = vector.broadcast %55 : i32 to vector<16x288xi32>
    %57 = arith.remsi %53, %56 : vector<16x288xi32>
    %c0_i32_33 = arith.constant 0 : i32
    %58 = vector.broadcast %c0_i32_33 : i32 to vector<16x288xi32>
    %59 = arith.cmpi ne, %57, %58 : vector<16x288xi32>
    %c0_i32_34 = arith.constant 0 : i32
    %60 = vector.broadcast %c0_i32_34 : i32 to vector<16x288xi32>
    %61 = arith.cmpi slt, %57, %60 : vector<16x288xi32>
    %c0_i32_35 = arith.constant 0 : i32
    %62 = arith.cmpi slt, %55, %c0_i32_35 : i32
    %63 = vector.broadcast %62 : i1 to vector<16x288xi1>
    %64 = vector.broadcast %63 : vector<16x288xi1> to vector<16x288xi1>
    %65 = arith.xori %61, %64 : vector<16x288xi1>
    %66 = arith.andi %65, %59 : vector<16x288xi1>
    %67 = vector.broadcast %55 : i32 to vector<16x288xi32>
    %68 = arith.addi %57, %67 : vector<16x288xi32>
    %69 = arith.select %66, %68, %57 : vector<16x288xi1>, vector<16x288xi32>
    %c16_i32 = arith.constant 16 : i32
    %70 = vector.broadcast %c16_i32 : i32 to vector<16x288xi32>
    %71 = arith.cmpi slt, %69, %70 : vector<16x288xi32>
    %cst_36 = arith.constant 0.000000e+00 : f32
    %72 = vector.broadcast %cst_36 : f32 to vector<16x326xf32>
    %c0_37 = arith.constant 0 : index
    %c0_38 = arith.constant 0 : index
    %73 = vector.load %arg8[%c0_37, %c0_38] : memref<16x326xf32, #tpu.memory_space<vmem>>, vector<16x326xf32>
    tpu.vector_store %arg8[%c0_37, %c0_38], %72 {strides = array<i32>} : memref<16x326xf32, #tpu.memory_space<vmem>>, vector<16x326xf32>,
    %cst_39 = arith.constant 0.000000e+00 : f32
    %74 = vector.broadcast %cst_39 : f32 to vector<16x288xf32>
    %75 = arith.select %71, %52, %74 : vector<16x288xi1>, vector<16x288xf32>
    %c0_40 = arith.constant 0 : index
    %c19 = arith.constant 19 : index
    %76 = vector.load %arg8[%c0_40, %c19] : memref<16x326xf32, #tpu.memory_space<vmem>>, vector<16x288xf32>
    tpu.vector_store %arg8[%c0_40, %c19], %75 {strides = array<i32>} : memref<16x326xf32, #tpu.memory_space<vmem>>, vector<16x288xf32>,
    %c0_41 = arith.constant 0 : index
    %c0_42 = arith.constant 0 : index
    %77 = vector.load %arg8[%c0_41, %c0_42] : memref<16x326xf32, #tpu.memory_space<vmem>>, vector<16x326xf32>
    %cst_43 = arith.constant 0.000000e+00 : f32
    %78 = vector.broadcast %cst_43 : f32 to vector<16x288xf32>
    %c0_44 = arith.constant 0 : index
    %c0_45 = arith.constant 0 : index
    %c0_46 = arith.constant 0 : index
    %79 = vector.load %arg4[%c0_44, %c0_45, %c0_46] : memref<9x16x16xf32, #tpu.memory_space<vmem>>, vector<1x16x16xf32>
    %80 = vector.shape_cast %79 : vector<1x16x16xf32> to vector<16x16xf32>
    %81 = vector.extract_strided_slice %77 {offsets = [0, 0], sizes = [16, 288], strides = [1, 1]} : vector<16x326xf32> to vector<16x288xf32>
    %cst_47 = arith.constant dense<0.000000e+00> : vector<16x288xf32>
    %82 = tpu.matmul %80, %81, %cst_47 {dimension_numbers = #tpu.dot_dimension_numbers<[1], [0], [0], [1], [0, 0, 1, 1], [], []>} : vector<16x16xf32>, vector<16x288xf32>, vector<16x288xf32> -> vector<16x288xf32>
    %83 = arith.addf %78, %82 : vector<16x288xf32>
    %c1_48 = arith.constant 1 : index
    %c0_49 = arith.constant 0 : index
    %c0_50 = arith.constant 0 : index
    %84 = vector.load %arg4[%c1_48, %c0_49, %c0_50] : memref<9x16x16xf32, #tpu.memory_space<vmem>>, vector<1x16x16xf32>
    %85 = vector.shape_cast %84 : vector<1x16x16xf32> to vector<16x16xf32>
    %86 = vector.extract_strided_slice %77 {offsets = [0, 1], sizes = [16, 288], strides = [1, 1]} : vector<16x326xf32> to vector<16x288xf32>
    %cst_51 = arith.constant dense<0.000000e+00> : vector<16x288xf32>
    %87 = tpu.matmul %85, %86, %cst_51 {dimension_numbers = #tpu.dot_dimension_numbers<[1], [0], [0], [1], [0, 0, 1, 1], [], []>} : vector<16x16xf32>, vector<16x288xf32>, vector<16x288xf32> -> vector<16x288xf32>
    %88 = arith.addf %83, %87 : vector<16x288xf32>
    %c2_52 = arith.constant 2 : index
    %c0_53 = arith.constant 0 : index
    %c0_54 = arith.constant 0 : index
    %89 = vector.load %arg4[%c2_52, %c0_53, %c0_54] : memref<9x16x16xf32, #tpu.memory_space<vmem>>, vector<1x16x16xf32>
    %90 = vector.shape_cast %89 : vector<1x16x16xf32> to vector<16x16xf32>
    %91 = vector.extract_strided_slice %77 {offsets = [0, 2], sizes = [16, 288], strides = [1, 1]} : vector<16x326xf32> to vector<16x288xf32>
    %cst_55 = arith.constant dense<0.000000e+00> : vector<16x288xf32>
    %92 = tpu.matmul %90, %91, %cst_55 {dimension_numbers = #tpu.dot_dimension_numbers<[1], [0], [0], [1], [0, 0, 1, 1], [], []>} : vector<16x16xf32>, vector<16x288xf32>, vector<16x288xf32> -> vector<16x288xf32>
    %93 = arith.addf %88, %92 : vector<16x288xf32>
    %c3_56 = arith.constant 3 : index
    %c0_57 = arith.constant 0 : index
    %c0_58 = arith.constant 0 : index
    %94 = vector.load %arg4[%c3_56, %c0_57, %c0_58] : memref<9x16x16xf32, #tpu.memory_space<vmem>>, vector<1x16x16xf32>
    %95 = vector.shape_cast %94 : vector<1x16x16xf32> to vector<16x16xf32>
    %96 = vector.extract_strided_slice %77 {offsets = [0, 18], sizes = [16, 288], strides = [1, 1]} : vector<16x326xf32> to vector<16x288xf32>
    %cst_59 = arith.constant dense<0.000000e+00> : vector<16x288xf32>
    %97 = tpu.matmul %95, %96, %cst_59 {dimension_numbers = #tpu.dot_dimension_numbers<[1], [0], [0], [1], [0, 0, 1, 1], [], []>} : vector<16x16xf32>, vector<16x288xf32>, vector<16x288xf32> -> vector<16x288xf32>
    %98 = arith.addf %93, %97 : vector<16x288xf32>
    %c4_60 = arith.constant 4 : index
    %c0_61 = arith.constant 0 : index
    %c0_62 = arith.constant 0 : index
    %99 = vector.load %arg4[%c4_60, %c0_61, %c0_62] : memref<9x16x16xf32, #tpu.memory_space<vmem>>, vector<1x16x16xf32>
    %100 = vector.shape_cast %99 : vector<1x16x16xf32> to vector<16x16xf32>
    %101 = vector.extract_strided_slice %77 {offsets = [0, 19], sizes = [16, 288], strides = [1, 1]} : vector<16x326xf32> to vector<16x288xf32>
    %cst_63 = arith.constant dense<0.000000e+00> : vector<16x288xf32>
    %102 = tpu.matmul %100, %101, %cst_63 {dimension_numbers = #tpu.dot_dimension_numbers<[1], [0], [0], [1], [0, 0, 1, 1], [], []>} : vector<16x16xf32>, vector<16x288xf32>, vector<16x288xf32> -> vector<16x288xf32>
    %103 = arith.addf %98, %102 : vector<16x288xf32>
    %c5_64 = arith.constant 5 : index
    %c0_65 = arith.constant 0 : index
    %c0_66 = arith.constant 0 : index
    %104 = vector.load %arg4[%c5_64, %c0_65, %c0_66] : memref<9x16x16xf32, #tpu.memory_space<vmem>>, vector<1x16x16xf32>
    %105 = vector.shape_cast %104 : vector<1x16x16xf32> to vector<16x16xf32>
    %106 = vector.extract_strided_slice %77 {offsets = [0, 20], sizes = [16, 288], strides = [1, 1]} : vector<16x326xf32> to vector<16x288xf32>
    %cst_67 = arith.constant dense<0.000000e+00> : vector<16x288xf32>
    %107 = tpu.matmul %105, %106, %cst_67 {dimension_numbers = #tpu.dot_dimension_numbers<[1], [0], [0], [1], [0, 0, 1, 1], [], []>} : vector<16x16xf32>, vector<16x288xf32>, vector<16x288xf32> -> vector<16x288xf32>
    %108 = arith.addf %103, %107 : vector<16x288xf32>
    %c6_68 = arith.constant 6 : index
    %c0_69 = arith.constant 0 : index
    %c0_70 = arith.constant 0 : index
    %109 = vector.load %arg4[%c6_68, %c0_69, %c0_70] : memref<9x16x16xf32, #tpu.memory_space<vmem>>, vector<1x16x16xf32>
    %110 = vector.shape_cast %109 : vector<1x16x16xf32> to vector<16x16xf32>
    %111 = vector.extract_strided_slice %77 {offsets = [0, 36], sizes = [16, 288], strides = [1, 1]} : vector<16x326xf32> to vector<16x288xf32>
    %cst_71 = arith.constant dense<0.000000e+00> : vector<16x288xf32>
    %112 = tpu.matmul %110, %111, %cst_71 {dimension_numbers = #tpu.dot_dimension_numbers<[1], [0], [0], [1], [0, 0, 1, 1], [], []>} : vector<16x16xf32>, vector<16x288xf32>, vector<16x288xf32> -> vector<16x288xf32>
    %113 = arith.addf %108, %112 : vector<16x288xf32>
    %c7_72 = arith.constant 7 : index
    %c0_73 = arith.constant 0 : index
    %c0_74 = arith.constant 0 : index
    %114 = vector.load %arg4[%c7_72, %c0_73, %c0_74] : memref<9x16x16xf32, #tpu.memory_space<vmem>>, vector<1x16x16xf32>
    %115 = vector.shape_cast %114 : vector<1x16x16xf32> to vector<16x16xf32>
    %116 = vector.extract_strided_slice %77 {offsets = [0, 37], sizes = [16, 288], strides = [1, 1]} : vector<16x326xf32> to vector<16x288xf32>
    %cst_75 = arith.constant dense<0.000000e+00> : vector<16x288xf32>
    %117 = tpu.matmul %115, %116, %cst_75 {dimension_numbers = #tpu.dot_dimension_numbers<[1], [0], [0], [1], [0, 0, 1, 1], [], []>} : vector<16x16xf32>, vector<16x288xf32>, vector<16x288xf32> -> vector<16x288xf32>
    %118 = arith.addf %113, %117 : vector<16x288xf32>
    %c8_76 = arith.constant 8 : index
    %c0_77 = arith.constant 0 : index
    %c0_78 = arith.constant 0 : index
    %119 = vector.load %arg4[%c8_76, %c0_77, %c0_78] : memref<9x16x16xf32, #tpu.memory_space<vmem>>, vector<1x16x16xf32>
    %120 = vector.shape_cast %119 : vector<1x16x16xf32> to vector<16x16xf32>
    %121 = vector.extract_strided_slice %77 {offsets = [0, 38], sizes = [16, 288], strides = [1, 1]} : vector<16x326xf32> to vector<16x288xf32>
    %cst_79 = arith.constant dense<0.000000e+00> : vector<16x288xf32>
    %122 = tpu.matmul %120, %121, %cst_79 {dimension_numbers = #tpu.dot_dimension_numbers<[1], [0], [0], [1], [0, 0, 1, 1], [], []>} : vector<16x16xf32>, vector<16x288xf32>, vector<16x288xf32> -> vector<16x288xf32>
    %123 = arith.addf %118, %122 : vector<16x288xf32>
    %c0_80 = arith.constant 0 : index
    %c0_81 = arith.constant 0 : index
    %124 = vector.load %arg5[%c0_80, %c0_81] : memref<16x1xf32, #tpu.memory_space<vmem>>, vector<16x1xf32>
    %125 = vector.broadcast %124 : vector<16x1xf32> to vector<16x288xf32>
    %126 = arith.addf %123, %125 : vector<16x288xf32>
    %c0_82 = arith.constant 0 : index
    %c0_83 = arith.constant 0 : index
    %c0_84 = arith.constant 0 : index
    %127 = vector.load %arg6[%c0_82, %c0_83, %c0_84] : memref<1x16x288xf32, #tpu.memory_space<vmem>>, vector<1x16x288xf32>
    %128 = vector.shape_cast %127 : vector<1x16x288xf32> to vector<16x288xf32>
    %129 = vector.shape_cast %126 : vector<16x288xf32> to vector<1x16x288xf32>
    tpu.vector_store %arg6[%c0_82, %c0_83, %c0_84], %129 {strides = array<i32>} : memref<1x16x288xf32, #tpu.memory_space<vmem>>, vector<1x16x288xf32>,
    %cst_85 = arith.constant 0.000000e+00 : f32
    %130 = vector.broadcast %cst_85 : f32 to vector<16x288xf32>
    %131 = arith.select %71, %126, %130 : vector<16x288xi1>, vector<16x288xf32>
    %cst_86 = arith.constant dense<0.000000e+00> : vector<16xf32>
    %132 = vector.multi_reduction <add>, %131, %cst_86 [1] : vector<16x288xf32> to vector<16xf32>
    %133 = vector.shape_cast %132 : vector<16xf32> to vector<16x1xf32>
    %c0_87 = arith.constant 0 : index
    %c0_88 = arith.constant 0 : index
    %c0_89 = arith.constant 0 : index
    %134 = vector.load %arg7[%c0_87, %c0_88, %c0_89] : memref<1x16x1xf32, #tpu.memory_space<vmem>>, vector<1x16x1xf32>
    %135 = vector.shape_cast %134 : vector<1x16x1xf32> to vector<16x1xf32>
    %136 = vector.shape_cast %133 : vector<16x1xf32> to vector<1x16x1xf32>
    tpu.vector_store %arg7[%c0_87, %c0_88, %c0_89], %136 {strides = array<i32>} : memref<1x16x1xf32, #tpu.memory_space<vmem>>, vector<1x16x1xf32>,
    return
  }
  func.func @transform_0(%arg0: i32) -> (i32, i32, i32) {
    %c0_i32 = arith.constant 0 : i32
    %c0_i32_0 = arith.constant 0 : i32
    %c0_i32_1 = arith.constant 0 : i32
    return %arg0, %c0_i32, %c0_i32_0 : i32, i32, i32
  }
  func.func @transform_1(%arg0: i32) -> (i32, i32, i32) {
    %c0_i32 = arith.constant 0 : i32
    %c0_i32_0 = arith.constant 0 : i32
    %c0_i32_1 = arith.constant 0 : i32
    %c0_i32_2 = arith.constant 0 : i32
    return %c0_i32, %c0_i32_0, %c0_i32_1 : i32, i32, i32
  }
  func.func @transform_2(%arg0: i32) -> (i32, i32) {
    %c0_i32 = arith.constant 0 : i32
    %c0_i32_0 = arith.constant 0 : i32
    %c0_i32_1 = arith.constant 0 : i32
    return %c0_i32, %c0_i32_0 : i32, i32
  }
  func.func @transform_3(%arg0: i32) -> (i32, i32, i32) {
    %c0_i32 = arith.constant 0 : i32
    %c0_i32_0 = arith.constant 0 : i32
    %c0_i32_1 = arith.constant 0 : i32
    %c0_i32_2 = arith.constant 0 : i32
    return %c0_i32, %c0_i32_0, %c0_i32_1 : i32, i32, i32
  }
  func.func @transform_4(%arg0: i32) -> (i32, i32) {
    %c0_i32 = arith.constant 0 : i32
    %c0_i32_0 = arith.constant 0 : i32
    %c0_i32_1 = arith.constant 0 : i32
    return %c0_i32, %c0_i32_0 : i32, i32
  }
  func.func @transform_5(%arg0: i32) -> (i32, i32, i32) {
    %c0_i32 = arith.constant 0 : i32
    %c0_i32_0 = arith.constant 0 : i32
    %c0_i32_1 = arith.constant 0 : i32
    return %arg0, %c0_i32, %c0_i32_0 : i32, i32, i32
  }
  func.func @transform_6(%arg0: i32) -> (i32, i32, i32) {
    %c0_i32 = arith.constant 0 : i32
    %c0_i32_0 = arith.constant 0 : i32
    %c0_i32_1 = arith.constant 0 : i32
    return %arg0, %c0_i32, %c0_i32_0 : i32, i32, i32
  }
}

</mosaic_0001>

<bundles_post_ra>
// kernel: tpu_custom_call.1
= control target key start
LH: loop header
LB: loop body
LE: loop exit
PB: predicated region body
PF: predicated region fallthrough
CT: control target
= control target key end

     0   :  { %12 = vsyncpa [#allocation4], 0  ;;  %s5862_s0 = inlined_call_operand.hbm [shape: f32[2,16,326], index: 0, kind: input, shape index: {}]   ;;  %s5863_s1 = inlined_call_operand.hbm [shape: f32[9,16,16], index: 1, kind: input, shape index: {}]   ;;  %s5864_s2 = inlined_call_operand.vmem [shape: f32[16,1], index: 2, kind: input, shape index: {}]   ;;  %s5865_s3 = inlined_call_operand.hbm [shape: f32[9,16,16], index: 3, kind: input, shape index: {}]   ;;  %s5866_s4 = inlined_call_operand.vmem [shape: f32[16,1], index: 4, kind: input, shape index: {}]   ;;  %s5867_s5 = inlined_call_operand.hbm [shape: f32[2,16,288], index: 5, kind: output, shape index: {0}]   ;;  %s5868_s6 = inlined_call_operand.vmem [shape: f32[2,16,1], index: 6, kind: output, shape index: {1}]  }
   0x1   :  { %14 = vsyncpa [#allocation4 + $0x1], 0 }
   0x2   :  { %15 = vsyncpa [#allocation7], 0 }
   0x3   :  { %16 = vsyncpa [#allocation5], 0 }
   0x4   :  { %18 = vsyncpa [#allocation5 + $0x1], 0  ;;  %s5064_s21 = smov 0   ;;  %s5066_s22 = smov 0  }
   0x5   :  { %s5068_s23 = smov 0   ;;  %s5070_s24 = smov 0  }
   0x6 LB: > { %s5085_s25 = sadd.s32 4294967295, %s5006_s24   ;;  %s3989_s26 = sadd.s32 4294967294, %s5006_s24   ;;  %s5006_s24 = sphi %s5070_s24, %s5901_s24   ;;  %s5002_s23 = sphi %s5068_s23, %s5900_s23   ;;  %s4998_s22 = sphi %s5066_s22, %s5899_s22   ;;  %s4994_s21 = sphi %s5064_s21, %s5898_s21  }
   0x7   : > { %p44_p0 = scmp.ne.s32.totalorder %s4998_s22, %s4994_s21  ;;  %p5869_p1 = scmp.eq.s32.totalorder %s5085_s25, 0 }
   0x8   : > { %p158_p3 = scmp.eq.s32.totalorder %s3989_s26, 1  ;;  %p3990_p5 = scmp.ge.s32.totalorder %s5006_s24, 1 }
   0x9   : > { %p5094_p4 = por %p5869_p1, %p44_p0  ;;  %p191_p7 = scmp.lt.s32.totalorder %s5006_s24, 3 }
   0xa   : > { %p5099_p6 = por %p158_p3, %p44_p0  ;;  %s5008_s30 = smov [#allocation6]  }
   0xb   : > { %s5873_s27 = scalar_select %p5094_p4, 1, 0 }
   0xc   : > { %s5874_s28 = scalar_select %p5099_p6, 1, 0 }
   0xd   : > { %p5104_p8 = pnand %p3990_p5, %p191_p7  ;;  %s203_s7 = sshll.u32 %s5008_s30, 4  ;;  %s5108_s7 = int_to_ptr.vmem [resolvable:$true] %s203_s7 }
   0xe   : > { %s5009_s9 = smov [#allocation8]   ;;  %s4850_s13 = scalar_lea.hbm %s5863_s1, 2304 }
   0xf   : > { %p4536_p9 = pneg %p5104_p8  ;;  %s219_s10 = sshll.u32 %s5009_s9, 4  ;;  %s5119_s10 = int_to_ptr.vmem [resolvable:$true] %s219_s10 }
  0x10   : > { %p4851_p12 = scmp.ne.s32.totalorder %s5863_s1, %s4850_s13  ;;  %p4857_p5 = scmp.lt.u32.totalorder %s4850_s13, %s5863_s1 }
  0x11   : > { %p5115_p11 = pnand %p4536_p9, %p5869_p1 }
  0x13   : > { %p4852_p13 = pneg %p5115_p11 }
  0x15   : > { %p4853_p0 = pnand %p4852_p13, %p4851_p12 }
  0x17   : > { %p4854_p3 = pneg %p4853_p0 }
  0x19   : > { %p4859_p7 = pnand %p4857_p5, %p4854_p3 }
  0x1b   : > { %4862 = shalt.err (!%p4859_p7)
}
  0x1c   : > { %s4863_s18 = scalar_lea.vmem %s5108_s7, 2304  ;;  %p4871_p2 = scmp.lt.s32.totalorder %s5108_s7, %s5108_s7 }
  0x1d   : > { %p4864_p9 = scmp.ne.s32.totalorder %s5108_s7, %s4863_s18  ;;  %p4872_p12 = scmp.lt.s32.totalorder %s4863_s18, %s4863_s18 }
  0x1f   : > { %p4866_p10 = pnand %p4864_p9, %p4852_p13  ;;  %p4873_p0 = por %p4872_p12, %p4871_p2 }
  0x21   : > { %p4867_p1 = pneg %p4866_p10 }
  0x23   : > { %p4874_p6 = pnand %p4873_p0, %p4867_p1 }
  0x25   : > { %4877 = shalt.err (!%p4874_p6)
}
  0x26   : > { %s5010_s19 = smov 128   ;;  %s5011_s20 = smov 8  }
  0x27   : > { %4539 = dma.hbm_to_vmem [thread:$0]  (!%p5115_p11), %s5863_s1, 2304, %s5108_s7, [#allocation7], %s5010_s19, %s5010_s19, %s5011_s20  }
  0x28   : > { %s4878_s12 = scalar_lea.hbm %s5865_s3, 2304 }
  0x29   : > { %p4879_p2 = scmp.ne.s32.totalorder %s5865_s3, %s4878_s12  ;;  %p4885_p10 = scmp.lt.u32.totalorder %s4878_s12, %s5865_s3 }
  0x2b   : > { %p4881_p1 = pnand %p4879_p2, %p4852_p13 }
  0x2d   : > { %p4882_p6 = pneg %p4881_p1 }
  0x2f   : > { %p4887_p3 = pnand %p4885_p10, %p4882_p6 }
  0x31   : > { %4890 = shalt.err (!%p4887_p3)
}
  0x32   : > { %s4891_s7 = scalar_lea.vmem %s5119_s10, 2304  ;;  %p4899_p12 = scmp.lt.s32.totalorder %s5119_s10, %s5119_s10 }
  0x33   : > { %p4892_p5 = scmp.ne.s32.totalorder %s5119_s10, %s4891_s7  ;;  %p4900_p0 = scmp.lt.s32.totalorder %s4891_s7, %s4891_s7 }
  0x35   : > { %p4894_p7 = pnand %p4892_p5, %p4852_p13  ;;  %p4901_p2 = por %p4900_p0, %p4899_p12 }
  0x37   : > { %p4895_p9 = pneg %p4894_p7 }
  0x39   : > { %p4902_p1 = pnand %p4901_p2, %p4895_p9 }
  0x3b   : > { %4905 = shalt.err (!%p4902_p1)
}
  0x3c   : > { %4542 = dma.hbm_to_vmem [thread:$0]  (!%p5115_p11), %s5865_s3, 2304, %s5119_s10, [#allocation7], %s5010_s19, %s5010_s19, %s5011_s20  }
  0x3d   : > { %s5174_s26 = sadd.s32 1, %s5006_s24   ;;  %s31_s8 = sadd.s32 1, %s5002_s23 }
  0x3e   : > { %s28_s30 = ssub.s32 %s5006_s24, %s5174_s26  ;;  %p38_p13 = scmp.ne.s32.totalorder %s5002_s23, %s4998_s22 }
  0x3f   : > { %p29_p6 = scmp.eq.s32.totalorder %s28_s30, 0  ;;  %p39_p10 = scmp.eq.s32.totalorder %s5006_s24, 0 }
  0x40   : > { %p5877_p3 = scmp.eq.s32.totalorder %s5085_s25, 1  ;;  %p4553_p7 = scmp.lt.s32.totalorder %s5006_s24, 2 }
  0x41   : > { %s5190_s11 = scalar_select %p29_p6, %s5002_s23, %s31_s8  }
  0x42   : > { %p5184_p5 = por %p5877_p3, %p38_p13  ;;  %p40_p9 = por %p39_p10, %p38_p13 }
  0x43   : > { %s236_s12 = sand.u32 1, %s5002_s23   ;;  %s4515_s10 = smul.u32 768, %s5006_s24 }
  0x44   : > { %s5878_s9 = scalar_select %p5184_p5, 1, 0 }
  0x45   : > { %s4514_s13 = smul.u32 48, %s236_s12  ;;  %p5194_p11 = pnand %p4553_p7, %p40_p9 }
  0x46   : > { %s5201_s15 = scalar_lea.hbm %s5862_s0, %s4515_s10  ;;  %s5205_s17 = scalar_lea.sflag [#allocation4], %s236_s12 }
  0x47   : > { %s240_s16 = scalar_lea.vmem [#allocation3], %s4514_s13  ;;  %s4906_s18 = scalar_lea.hbm %s5201_s15, 768 }
  0x48   : > { %s247_s7 = sshll.u32 %s240_s16, 4  ;;  %p4907_p12 = scmp.ne.s32.totalorder %s5201_s15, %s4906_s18  ;;  %s5203_s7 = int_to_ptr.vmem [resolvable:$true] %s247_s7 }
  0x49   : > { %p4908_p0 = pneg %p5194_p11  ;;  %s4911_s10 = scalar_lea.hbm %s5862_s0, 1536 }
  0x4a   : > { %p4912_p13 = scmp.lt.u32.totalorder %s5201_s15, %s5862_s0  ;;  %p4913_p6 = scmp.lt.u32.totalorder %s4911_s10, %s4906_s18 }
  0x4b   : > { %p4909_p2 = pnand %p4908_p0, %p4907_p12  ;;  %p4915_p3 = scmp.lt.u32.totalorder %s4906_s18, %s5201_s15 }
  0x4c   : > { %p4914_p10 = por %p4913_p6, %p4912_p13 }
  0x4d   : > { %p4910_p1 = pneg %p4909_p2 }
  0x4e   : > { %p4916_p7 = por %p4915_p3, %p4914_p10 }
  0x50   : > { %p4917_p9 = pnand %p4916_p7, %p4910_p1 }
  0x52   : > { %4920 = shalt.err (!%p4917_p9)
}
  0x53   : > { %s4921_s12 = scalar_lea.vmem %s5203_s7, 768  ;;  %s5012_s13 = smov [#allocation3]  }
  0x54   : > { %p4922_p12 = scmp.ne.s32.totalorder %s5203_s7, %s4921_s12  ;;  %s4926_s16 = sshll.u32 %s5012_s13, 4  ;;  %s4927_s16 = int_to_ptr.vmem [resolvable:$false] %s4926_s16 }
  0x55   : > { %s4928_s8 = scalar_lea.vmem %s4927_s16, 1536  ;;  %p4929_p4 = scmp.lt.s32.totalorder %s5203_s7, %s4927_s16 }
  0x56   : > { %p4924_p2 = pnand %p4922_p12, %p4908_p0  ;;  %p4930_p13 = scmp.lt.s32.totalorder %s4928_s8, %s4921_s12 }
  0x58   : > { %p4925_p5 = pneg %p4924_p2  ;;  %p4931_p6 = por %p4930_p13, %p4929_p4 }
  0x5a   : > { %p4932_p10 = pnand %p4931_p6, %p4925_p5 }
  0x5c   : > { %4935 = shalt.err (!%p4932_p10)
}
  0x5d   : > { %s5013_s18 = smov 384   ;;  %s5014_s30 = smov 24  }
  0x5e   : > { %4546 = dma.hbm_to_vmem [thread:$0]  (!%p5194_p11), %s5201_s15, 768, %s5203_s7, %s5205_s17, %s5013_s18, %s5013_s18, %s5014_s30  }
  0x5f   : > { %259 = sbr.rel (%p5104_p8) target bundleno = 1222 (0x4c6), region = 40  ;;  %s5236_s10 = sand.u32 (!%p5104_p8), 1, %s4998_s22  }
  0x60   : > { %s4516_s20 = smul.u32 (!%p5104_p8), 48, %s5236_s10  ;;  %s262_s14 = scalar_lea.sflag (!%p5104_p8), [#allocation4], %s5236_s10 }
  0x61   : > { %p5880_p4 = scmp.ne.s32.totalorder (!%p5104_p8), %s5873_s27, 0 }
  0x62   : > { %s265_s12 = scalar_lea.vmem (!%p5104_p8), [#allocation3], %s4516_s20 }
  0x66   : > { %4981 = dma.done.wait (%p5880_p4), %s262_s14, 768  }
  0x67   : > { %4983 = vsyncadd (%p5880_p4), %s262_s14, 4294966528  ;;  %p5881_p5 = scmp.eq.s32.totalorder %s5085_s25, 0 }
  0x69   : > { %4985 = dma.done.wait (%p5881_p5), [#allocation7], 4608   ;;  %p5882_p8 = pmov %p5881_p5 }
  0x6a   : > { %v5250_v0 = vld [vmem:[%s265_s12 + $0x8] sm:$0xff]  ;;  %v314_v1 = vld [vmem:[%s265_s12 + $0x10] sm:$0xff]  ;;  %v5252_v2 = vld [vmem:[%s265_s12] sm:$0xff]  ;;  %vm352_vm0 = vcmask 130048   ;;  %s5015_s27 = smov 127   ;;  %s5016_s29 = smov 126  }
  0x6b   : > { %4987 = vsyncadd (%p5882_p8), [#allocation7], 4294962688  ;;  %v4608_v3 = vpack.i.bf16 %v314_v1, %v5250_v0  ;;  %v5255_v4 = vld [vmem:[%s265_s12 + $0x18] sm:$0xff]  ;;  %v5257_v5 = vld [vmem:[%s265_s12 + $0x20] sm:$0xff]  ;;  %v5017_v11 = vmov 0.0   ;;  %s5018_s19 = smov 110  }
  0x6c   : > { %v317_v6 = vld [vmem:[%s265_s12 + $0x28] sm:$0xff]  ;;  %v4618_v7 = vpack.i.bf16 %v5255_v4, %v5252_v2  ;;  %v5261_v8 = vld [vmem:[#allocation6] sm:$0xff]  ;;  %423 = vmatprep.mubr.f32.mxu0 %v5017_v11  ;;  %2078 = vst [vmem:[#allocation2] sm:$0xff] %v5017_v11  ;;  %2082 = vst [vmem:[#allocation2 + $0x18] sm:$0xff] %v5017_v11  ;;  %v4282_v12 = vpack.c.bf16 %v5257_v5, %v5250_v0  ;;  %v4284_v15 = vpack.c.bf16 %v5255_v4, %v5252_v2  ;;  %s5019_s15 = smov 109   ;;  %s5020_s7 = smov 108  }
  0x6d   : > { %4609 = vrot.lane.b32.xlu0 %v4608_v3, %s5015_s27  ;;  %v4613_v9 = vpack.i.bf16 %v317_v6, %v5257_v5  ;;  %4159 = vmatprep.mubr.msk.f32.mxu1 %vm352_vm0, %v5261_v8  ;;  %v4286_v10 = vpack.c.bf16 %v317_v6, %v314_v1  ;;  %v5275_v13 = vld [vmem:[#allocation6 + $0x8] sm:$0xff]  ;;  %v5278_v14 = vld [vmem:[#allocation6 + $0x20] sm:$0xff]  ;;  %s5021_s17 = smov 92   ;;  %s5022_s13 = smov 91   ;;  %v2000_v16 = vld [vmem:[%s5864_s2 + $0x8] sm:$0xff]  ;;  %v5024_v18 = vmov 0  }
  0x6e   : > { %4619 = vrot.lane.b32.xlu1 %v4618_v7, %s5015_s27  ;;  %s5023_s16 = smov 90   ;;  %v1999_v17 = vld [vmem:[%s5864_s2] sm:$0xff]  ;;  %4728 = vset.pattern.permute.xlu0 %v5024_v18  ;;  %vm341_vm1 = vcmask 1039360   ;;  %vm684_vm2 = vcmask 1031168   ;;  %v5322_v48 = vld [vmem:[#allocation6 + $0x28] sm:$0xff]  ;;  %v322_v49 = vld [vmem:[#allocation6 + $0x18] sm:$0xff] }
  0x6f   : > { %4287 = vmatprep.subr.bf16.mxu1 %v4286_v10  ;;  %4729 = vset.pattern.permute.xlu1 %v5024_v18  ;;  %v321_v41 = vld [vmem:[#allocation6 + $0x10] sm:$0xff]  ;;  %vm874_vm3 = vcmask 900096   ;;  %vm1064_vm4 = vcmask 891904   ;;  %vm1254_vm5 = vcmask 883712   ;;  %vm1444_vm6 = vcmask 752640   ;;  %s5025_s12 = smov 19  }
  0x70   : > { %4289 = vmatpush3.bf16.msra.mxu1 %v4286_v10  ;;  %v5336_v59 = vld [vmem:[#allocation6 + $0x30] sm:$0xff]  ;;  %vm1634_vm7 = vcmask 744448   ;;  %vm5872_vm8 = vcmask 736256   ;;  %vm2080_vm12 = vcmask 572416   ;;  %s3851_s18 = scalar_lea.sflag [#allocation5], %s5236_s10  ;;  %p5895_p0 = scmp.ne.s32.totalorder %s5878_s9, 0 }
  0x71   : > { %4614 = vrot.lane.b32.xlu0 %v4613_v9, %s5015_s27  ;;  %2081 = vst.msk [vmem:[#allocation2 + $0x10] sm:$0xff] %vm2080_vm12, %v5017_v11  ;;  %2084 = vst.msk [vmem:[#allocation2 + $0x28] sm:$0xff] %vm2080_vm12, %v5017_v11  ;;  %s5026_s14 = smov [#allocation9]  }
  0x72   : > { %4624 = vrot.lane.b32.xlu1 %v4608_v3, %s5016_s29 }
  0x73   : > { %4160 = vmatmul.mubr.msk.f32.vlgmr.msra.gmra.mrb[0].mxu1 %vm352_vm0, %v5275_v13 }
  0x74   : > { %4166 = vmatprep.mubr.msk.f32.mxu1 %vm352_vm0, %v5278_v14 }
  0x75   : > { %4629 = vrot.lane.b32.xlu0 %v4613_v9, %s5016_s29 }
  0x76   : > { %4634 = vrot.lane.b32.xlu1 %v4618_v7, %s5016_s29 }
  0x79   : > { %4639 = vrot.lane.b32.xlu0 %v4608_v3, %s5018_s19 }
  0x7a   : > { %4644 = vrot.lane.b32.xlu1 %v4613_v9, %s5018_s19 }
  0x7d   : > { %4649 = vrot.lane.b32.xlu0 %v4618_v7, %s5018_s19 }
  0x7e   : > { %4654 = vrot.lane.b32.xlu1 %v4608_v3, %s5019_s15 }
  0x81   : > { %4659 = vrot.lane.b32.xlu0 %v4613_v9, %s5019_s15 }
  0x82   : > { %4664 = vrot.lane.b32.xlu1 %v4618_v7, %s5019_s15 }
  0x85   : > { %4669 = vrot.lane.b32.xlu0 %v4608_v3, %s5020_s7 }
  0x86   : > { %4674 = vrot.lane.b32.xlu1 %v4613_v9, %s5020_s7 }
  0x89   : > { %4679 = vrot.lane.b32.xlu0 %v4618_v7, %s5020_s7 }
  0x8a   : > { %4684 = vrot.lane.b32.xlu1 %v4608_v3, %s5021_s17 }
  0x8d   : > { %4689 = vrot.lane.b32.xlu0 %v4613_v9, %s5021_s17 }
  0x8e   : > { %4694 = vrot.lane.b32.xlu1 %v4618_v7, %s5021_s17 }
  0x91   : > { %4699 = vrot.lane.b32.xlu0 %v4608_v3, %s5022_s13 }
  0x92   : > { %4704 = vrot.lane.b32.xlu1 %v4613_v9, %s5022_s13 }
  0x95   : > { %4709 = vrot.lane.b32.xlu0 %v4618_v7, %s5022_s13 }
  0x96   : > { %4714 = vrot.lane.b32.xlu1 %v4608_v3, %s5023_s16 }
  0x99   : > { %4719 = vrot.lane.b32.xlu0 %v4613_v9, %s5023_s16 }
  0x9a   : > { %4724 = vrot.lane.b32.xlu1 %v4618_v7, %s5023_s16  ;;  %v5351_v7 = vld [vmem:[#allocation6 + $0x38] sm:$0xff] }
  0x9d   : > { %2003 = vperm.xlu0 %4728, %v1999_v17  }
  0x9e   : > { %2008 = vperm.xlu1 %4729, %v2000_v16  }
  0xdf   : > { %v4610_v19 = vpop.permute.xlu0 %4609 }
  0xe0   : > { %v4620_v20 = vpop.permute.xlu1 %4619  ;;  %v4612_v21 = vunpack.i.h.bf16 %v4610_v19  ;;  %v4611_v22 = vunpack.i.l.bf16 %v4610_v19 }
  0xe1   : > { %v4622_v23 = vunpack.i.h.bf16 %v4620_v20  ;;  %v4621_v24 = vunpack.i.l.bf16 %v4620_v20 }
  0xe2   : > { %v343_v29 = vsel %vm341_vm1, %v4611_v22, %v4612_v21 }
  0xe3   : > { %v4615_v25 = vpop.permute.xlu0 %4614  ;;  %v342_v32 = vsel %vm341_vm1, %v4621_v24, %v4611_v22 }
  0xe4   : > { %v4617_v26 = vunpack.i.h.bf16 %v4615_v25  ;;  %v4616_v27 = vunpack.i.l.bf16 %v4615_v25  ;;  %v4625_v28 = vpop.permute.xlu1 %4624 }
  0xe5   : > { %v4627_v30 = vunpack.i.h.bf16 %v4625_v28  ;;  %v4626_v44 = vunpack.i.l.bf16 %v4625_v28  ;;  %v5382_v28 = vld [vmem:[#allocation6 + $0x48] sm:$0xff] }
  0xe6   : > { %v345_v31 = vsel %vm341_vm1, %v4616_v27, %v4617_v26  ;;  %v344_v33 = vsel %vm341_vm1, %v4622_v23, %v4616_v27  ;;  %v4278_v39 = vpack.c.bf16 %v4617_v26, %v4612_v21 }
  0xe7   : > { %v4630_v34 = vpop.permute.xlu0 %4629  ;;  %v4274_v35 = vpack.c.bf16 %v345_v31, %v343_v29  ;;  %v4276_v36 = vpack.c.bf16 %v344_v33, %v342_v32  ;;  %v686_v56 = vsel %vm684_vm2, %v4626_v44, %v4627_v30 }
  0xe8   : > { %v4632_v37 = vunpack.i.h.bf16 %v4630_v34  ;;  %v4635_v38 = vpop.permute.xlu1 %4634  ;;  %v4631_v43 = vunpack.i.l.bf16 %v4630_v34 }
  0xe9   : > { %4275 = vmatprep.subr.bf16.mxu0 %v4274_v35  ;;  %v4637_v50 = vunpack.i.h.bf16 %v4635_v38  ;;  %v4636_v51 = vunpack.i.l.bf16 %v4635_v38 }
  0xea   : > { %v4294_v40 = vpack.c.bf16 %v4632_v37, %v4627_v30  ;;  %4277 = vmatpush1.bf16.msra.mxu0 %v4276_v36  ;;  %v688_v57 = vsel %vm684_vm2, %v4631_v43, %v4632_v37  ;;  %v5393_v37 = vld [vmem:[#allocation6 + $0x50] sm:$0xff] }
  0xeb   : > { %4279 = vmatprep.subr.bf16.mxu0 %v4278_v39  ;;  %v5315_v42 = vpop.permute.xlu0 %4639  ;;  %v687_v61 = vsel %vm684_vm2, %v4637_v50, %v4631_v43  ;;  %v685_v62 = vsel %vm684_vm2, %v4636_v51, %v4626_v44  ;;  %v4290_v63 = vpack.c.bf16 %v688_v57, %v686_v56  ;;  %v5423_v56 = vld [vmem:[#allocation6 + $0x60] sm:$0xff] }
  0xec   : > { %4295 = vmatprep.subr.bf16.mxu1 %v4294_v40  ;;  %v4642_v45 = vunpack.i.h.bf16 %v5315_v42  ;;  %v5318_v46 = vpop.permute.xlu1 %4644  ;;  %v4641_v54 = vunpack.i.l.bf16 %v5315_v42  ;;  %v4292_v9 = vpack.c.bf16 %v687_v61, %v685_v62 }
  0xed   : > { %4000 = vmatmul.mubr.msk.f32.vlgmr.msra.gmra.mrb[0].mxu0 %vm352_vm0, %v321_v41  ;;  %4297 = vmatpush3.bf16.msra.mxu1 %v4294_v40  ;;  %v4647_v47 = vunpack.i.h.bf16 %v5318_v46  ;;  %v4646_v55 = vunpack.i.l.bf16 %v5318_v46  ;;  %v5413_v46 = vld [vmem:[#allocation6 + $0x58] sm:$0xff] }
  0xee   : > { %4281 = vmatpush3.bf16.msra.mxu0 %v4278_v39  ;;  %429 = vmatprep.mubr.f32.mxu0 %v5017_v11  ;;  %v876_v5 = vsel %vm874_vm3, %v4641_v54, %v4642_v45 }
  0xef   : > { %v4302_v52 = vpack.c.bf16 %v4647_v47, %v4642_v45  ;;  %v4650_v53 = vpop.permute.xlu0 %4649  ;;  %4283 = vmatprep.subr.bf16.mxu0 %v4282_v12  ;;  %v878_v6 = vsel %vm874_vm3, %v4646_v55, %v4647_v47 }
  0xf0   : > { %4167 = vmatmul.mubr.msk.f32.vlgmr.msra.gmra.mrb[0].mxu1 %vm352_vm0, %v5322_v48  ;;  %v5334_v58 = vpop.permute.xlu1 %4654  ;;  %v4652_v12 = vunpack.i.h.bf16 %v4650_v53  ;;  %v4651_v16 = vunpack.i.l.bf16 %v4650_v53  ;;  %v4298_v17 = vpack.c.bf16 %v878_v6, %v876_v5 }
  0xf1   : > { %4001 = vmatmul.mubr.msk.f32.gmra.mrb[2].mxu0 %vm352_vm0, %v322_v49  ;;  %4303 = vmatprep.subr.bf16.mxu1 %v4302_v52  ;;  %v4657_v60 = vunpack.i.h.bf16 %v5334_v58  ;;  %v4656_v20 = vunpack.i.l.bf16 %v5334_v58 }
  0xf2   : > { %4152 = vmatprep.mubr.msk.f32.mxu0 %vm352_vm0, %v321_v41  ;;  %4305 = vmatpush3.bf16.msra.mxu1 %v4302_v52  ;;  %v875_v22 = vsel %vm874_vm3, %v4651_v16, %v4641_v54  ;;  %v877_v23 = vsel %vm874_vm3, %v4652_v12, %v4646_v55 }
  0xf3   : > { %v5343_v0 = vpop.permute.xlu0 %4659  ;;  %4173 = vmatprep.mubr.msk.f32.mxu1 %vm352_vm0, %v5336_v59  ;;  %v1066_v26 = vsel %vm1064_vm4, %v4656_v20, %v4657_v60  ;;  %v4300_v29 = vpack.c.bf16 %v877_v23, %v875_v22 }
  0xf4   : > { %v4662_v1 = vunpack.i.h.bf16 %v5343_v0  ;;  %v4665_v3 = vpop.permute.xlu1 %4664  ;;  %v4661_v19 = vunpack.i.l.bf16 %v5343_v0 }
  0xf5   : > { %4153 = vmatmul.mubr.msk.f32.vlgmr.msra.gmra.mrb[4].mxu0 %vm352_vm0, %v322_v49  ;;  %v4667_v31 = vunpack.i.h.bf16 %v4665_v3  ;;  %v4666_v32 = vunpack.i.l.bf16 %v4665_v3 }
  0xf6   : > { %4285 = vmatpush1.bf16.msra.mxu0 %v4284_v15  ;;  %v4310_v10 = vpack.c.bf16 %v4662_v1, %v4657_v60  ;;  %581 = vmatprep.mubr.f32.mxu0 %v5017_v11  ;;  %v5366_v15 = vld [vmem:[#allocation6 + $0x40] sm:$0xff] }
  0xf7   : > { %4291 = vmatprep.subr.bf16.mxu0 %v4290_v63  ;;  %v5357_v18 = vpop.permute.xlu0 %4669  ;;  %v1067_v40 = vsel %vm1064_vm4, %v4667_v31, %v4661_v19  ;;  %v1065_v41 = vsel %vm1064_vm4, %v4666_v32, %v4656_v20 }
  0xf8   : > { %4174 = vmatmul.mubr.msk.f32.vlgmr.msra.gmra.mrb[0].mxu1 %vm352_vm0, %v5351_v7  ;;  %4311 = vmatprep.subr.bf16.mxu1 %v4310_v10  ;;  %v4672_v2 = vunpack.i.h.bf16 %v5357_v18  ;;  %v5364_v4 = vpop.permute.xlu1 %4674  ;;  %v4671_v35 = vunpack.i.l.bf16 %v5357_v18  ;;  %v4308_v49 = vpack.c.bf16 %v1067_v40, %v1065_v41 }
  0xf9   : > { %4004 = vmatmul.mubr.msk.f32.vlgmr.msra.gmra.mrb[0].mxu0 %vm352_vm0, %v5261_v8  ;;  %4313 = vmatpush3.bf16.msra.mxu1 %v4310_v10  ;;  %v4677_v21 = vunpack.i.h.bf16 %v5364_v4  ;;  %v1068_v8 = vsel %vm1064_vm4, %v4661_v19, %v4662_v1  ;;  %v4676_v36 = vunpack.i.l.bf16 %v5364_v4  ;;  %v1431_v1 = vld [vmem:[#allocation6 + $0x68] sm:$0xff] }
  0xfa   : > { %4293 = vmatpush1.bf16.msra.mxu0 %v4292_v9  ;;  %587 = vmatprep.mubr.f32.mxu0 %v5017_v11  ;;  %v4306_v33 = vpack.c.bf16 %v1068_v8, %v1066_v26  ;;  %v1256_v43 = vsel %vm1254_vm5, %v4671_v35, %v4672_v2 }
  0xfb   : > { %4299 = vmatprep.subr.bf16.mxu0 %v4298_v17  ;;  %v4318_v24 = vpack.c.bf16 %v4677_v21, %v4672_v2  ;;  %4180 = vmatprep.mubr.msk.f32.mxu1 %vm352_vm0, %v5366_v15  ;;  %v4680_v25 = vpop.permute.xlu0 %4679  ;;  %v1620_v17 = vld [vmem:[#allocation6 + $0x70] sm:$0xff]  ;;  %v1621_v2 = vld [vmem:[#allocation6 + $0x78] sm:$0xff] }
  0xfc   : > { %v5378_v27 = vpop.permute.xlu1 %4684  ;;  %v4682_v50 = vunpack.i.h.bf16 %v4680_v25  ;;  %v4681_v51 = vunpack.i.l.bf16 %v4680_v25  ;;  %v1810_v25 = vld [vmem:[#allocation6 + $0x80] sm:$0xff] }
  0xfd   : > { %4005 = vmatmul.mubr.msk.f32.gmra.mrb[2].mxu0 %vm352_vm0, %v5275_v13  ;;  %4319 = vmatprep.subr.bf16.mxu1 %v4318_v24  ;;  %v4687_v30 = vunpack.i.h.bf16 %v5378_v27  ;;  %v4686_v55 = vunpack.i.l.bf16 %v5378_v27 }
  0xfe   : > { %765 = vmatprep.mubr.f32.mxu0 %v5017_v11  ;;  %v1255_v58 = vsel %vm1254_vm5, %v4681_v51, %v4671_v35  ;;  %v1257_v60 = vsel %vm1254_vm5, %v4682_v50, %v4676_v36 }
  0xff   : > { %v5386_v34 = vpop.permute.xlu0 %4689  ;;  %v4316_v3 = vpack.c.bf16 %v1257_v60, %v1255_v58 }
 0x100   : > { %4181 = vmatmul.mubr.msk.f32.vlgmr.msra.gmra.mrb[0].mxu1 %vm352_vm0, %v5382_v28  ;;  %v4692_v13 = vunpack.i.h.bf16 %v5386_v34  ;;  %v5395_v38 = vpop.permute.xlu1 %4694  ;;  %v4691_v54 = vunpack.i.l.bf16 %v5386_v34 }
 0x101   : > { %4008 = vmatmul.mubr.msk.f32.vlgmr.msra.gmra.mrb[0].mxu0 %vm352_vm0, %v5278_v14  ;;  %4321 = vmatpush3.bf16.msra.mxu1 %v4318_v24  ;;  %v1258_v14 = vsel %vm1254_vm5, %v4676_v36, %v4677_v21  ;;  %v4697_v5 = vunpack.i.h.bf16 %v5395_v38  ;;  %v4696_v6 = vunpack.i.l.bf16 %v5395_v38 }
 0x102   : > { %4301 = vmatpush1.bf16.msra.mxu0 %v4300_v29  ;;  %771 = vmatprep.mubr.f32.mxu0 %v5017_v11  ;;  %v4326_v39 = vpack.c.bf16 %v4692_v13, %v4687_v30  ;;  %v4314_v52 = vpack.c.bf16 %v1258_v14, %v1256_v43  ;;  %v1448_v62 = vsel %vm1444_vm6, %v4691_v54, %v4692_v13 }
 0x103   : > { %4307 = vmatprep.subr.bf16.mxu0 %v4306_v33  ;;  %4187 = vmatprep.mubr.msk.f32.mxu1 %vm352_vm0, %v5393_v37  ;;  %v5404_v42 = vpop.permute.xlu0 %4699  ;;  %v1445_v18 = vsel %vm1444_vm6, %v4696_v6, %v4686_v55 }
 0x104   : > { %4327 = vmatprep.subr.bf16.mxu1 %v4326_v39  ;;  %v4702_v44 = vunpack.i.h.bf16 %v5404_v42  ;;  %v5409_v45 = vpop.permute.xlu1 %4704  ;;  %v4701_v10 = vunpack.i.l.bf16 %v5404_v42 }
 0x105   : > { %4009 = vmatmul.mubr.msk.f32.gmra.mrb[2].mxu0 %vm352_vm0, %v5322_v48  ;;  %v4707_v47 = vunpack.i.h.bf16 %v5409_v45  ;;  %v4706_v12 = vunpack.i.l.bf16 %v5409_v45 }
 0x106   : > { %955 = vmatprep.mubr.f32.mxu0 %v5017_v11  ;;  %v1636_v19 = vsel %vm1634_vm7, %v4701_v10, %v4702_v44 }
 0x107   : > { %v5417_v53 = vpop.permute.xlu0 %4709  ;;  %v4334_v48 = vpack.c.bf16 %v4707_v47, %v4702_v44  ;;  %v1638_v20 = vsel %vm1634_vm7, %v4706_v12, %v4707_v47 }
 0x108   : > { %4188 = vmatmul.mubr.msk.f32.vlgmr.msra.gmra.mrb[0].mxu1 %vm352_vm0, %v5413_v46  ;;  %v5427_v57 = vpop.permute.xlu1 %4714  ;;  %v4711_v21 = vunpack.i.l.bf16 %v5417_v53  ;;  %v4330_v22 = vpack.c.bf16 %v1638_v20, %v1636_v19 }
 0x109   : > { %4012 = vmatmul.mubr.msk.f32.vlgmr.msra.gmra.mrb[0].mxu0 %vm352_vm0, %v5336_v59  ;;  %4329 = vmatpush3.bf16.msra.mxu1 %v4326_v39  ;;  %v1446_v59 = vsel %vm1444_vm6, %v4686_v55, %v4687_v30  ;;  %v4717_v0 = vunpack.i.h.bf16 %v5427_v57  ;;  %v4716_v24 = vunpack.i.l.bf16 %v5427_v57  ;;  %v1811_v30 = vld [vmem:[#allocation6 + $0x88] sm:$0xff]  ;;  %v2023_v39 = vlaneseq }
 0x10a   : > { %4309 = vmatpush1.bf16.msra.mxu0 %v4308_v49  ;;  %961 = vmatprep.mubr.f32.mxu0 %v5017_v11  ;;  %v4322_v9 = vpack.c.bf16 %v1448_v62, %v1446_v59  ;;  %v1635_v26 = vsel %vm1634_vm7, %v4711_v21, %v4701_v10 }
 0x10b   : > { %4315 = vmatprep.subr.bf16.mxu0 %v4314_v52  ;;  %4194 = vmatprep.mubr.msk.f32.mxu1 %vm352_vm0, %v5423_v56  ;;  %v5434_v61 = vpop.permute.xlu0 %4719  ;;  %v2024_v40 = vand.u32 127, %v2023_v39 }
 0x10c   : > { %4335 = vmatprep.subr.bf16.mxu1 %v4334_v48  ;;  %v4722_v63 = vunpack.i.h.bf16 %v5434_v61  ;;  %v4721_v23 = vunpack.i.l.bf16 %v5434_v61  ;;  %v4725_v27 = vpop.permute.xlu1 %4724 }
 0x10d   : > { %4013 = vmatmul.mubr.msk.f32.gmra.mrb[2].mxu0 %vm352_vm0, %v5351_v7  ;;  %v1447_v7 = vsel %vm1444_vm6, %v4697_v5, %v4691_v54  ;;  %v4727_v32 = vunpack.i.h.bf16 %v4725_v27  ;;  %v4726_v33 = vunpack.i.l.bf16 %v4725_v27  ;;  %v2026_v41 = vadd.s32 256, %v2024_v40 }
 0x10e   : > { %1145 = vmatprep.mubr.f32.mxu0 %v5017_v11  ;;  %v4342_v16 = vpack.c.bf16 %v4722_v63, %v4717_v0  ;;  %v4324_v4 = vpack.c.bf16 %v1447_v7, %v1445_v18  ;;  %v1828_v29 = vsel %vm5872_vm8, %v4721_v23, %v4722_v63  ;;  %v2025_v44 = vadd.s32 128, %v2024_v40 }
 0x10f   : > { %v1827_v35 = vsel %vm5872_vm8, %v4727_v32, %v4721_v23  ;;  %v1825_v36 = vsel %vm5872_vm8, %v4726_v33, %v4716_v24  ;;  %v5491_v42 = vmul.u32.u64.low 3817748708, %v2026_v41  ;;  %v5492_v43 = vmul.u32.u64.high 3817748708, %v2026_v41, %v5491_v42 }
 0x110   : > { %4195 = vmatmul.mubr.msk.f32.vlgmr.msra.gmra.mrb[0].mxu1 %vm352_vm0, %v1431_v1  ;;  %v4340_v13 = vpack.c.bf16 %v1827_v35, %v1825_v36  ;;  %v5498_v50 = vmul.u32.u64.low 3817748708, %v2024_v40  ;;  %v5499_v51 = vmul.u32.u64.high 3817748708, %v2024_v40, %v5498_v50 }
 0x111   : > { %4016 = vmatmul.mubr.msk.f32.vlgmr.msra.gmra.mrb[0].mxu0 %vm352_vm0, %v5366_v15  ;;  %4337 = vmatpush3.bf16.msra.mxu1 %v4334_v48  ;;  %v4712_v15 = vunpack.i.h.bf16 %v5417_v53  ;;  %v2055_v14 = vshrl.u32 %v5492_v43, 4  ;;  %v5545_v43 = vld [vmem:[#allocation8 + $0x10] sm:$0xff] }
 0x112   : > { %4317 = vmatpush1.bf16.msra.mxu0 %v4316_v3  ;;  %1151 = vmatprep.mubr.f32.mxu0 %v5017_v11 }
 0x113   : > { %4323 = vmatprep.subr.bf16.mxu0 %v4322_v9  ;;  %4201 = vmatprep.mubr.msk.f32.mxu1 %vm352_vm0, %v1620_v17  ;;  %v1637_v8 = vsel %vm1634_vm7, %v4712_v15, %v4706_v12  ;;  %v2056_v45 = vmul.u32 18, %v2055_v14 }
 0x114   : > { %4343 = vmatprep.subr.bf16.mxu1 %v4342_v16  ;;  %v4332_v31 = vpack.c.bf16 %v1637_v8, %v1635_v26 }
 0x115   : > { %4017 = vmatmul.mubr.msk.f32.gmra.mrb[2].mxu0 %vm352_vm0, %v5382_v28  ;;  %v1826_v28 = vsel %vm5872_vm8, %v4716_v24, %v4717_v0  ;;  %v2057_v49 = vsub.s32 %v2026_v41, %v2056_v45  ;;  %v2033_v0 = vshrl.u32 %v5499_v51, 4 }
 0x116   : > { %1335 = vmatprep.mubr.f32.mxu0 %v5017_v11  ;;  %v4338_v34 = vpack.c.bf16 %v1828_v29, %v1826_v28 }
 0x117   : > { %vm2062_vm9 = vcmp.ne.s32.totalorder %v2057_v49, 0  ;;  %vm2065_vm10 = vcmp.lt.s32.totalorder %v2057_v49, 0  ;;  %v2071_v52 = vadd.s32 18, %v2057_v49  ;;  %v2034_v10 = vmul.u32 18, %v2033_v0 }
 0x118   : > { %4202 = vmatmul.mubr.msk.f32.vlgmr.msra.gmra.mrb[0].mxu1 %vm352_vm0, %v1621_v2  ;;  %vm5501_vm11 = vmand %vm2065_vm10, %vm2062_vm9 }
 0x119   : > { %4020 = vmatmul.mubr.msk.f32.vlgmr.msra.gmra.mrb[0].mxu0 %vm352_vm0, %v5393_v37  ;;  %4345 = vmatpush3.bf16.msra.mxu1 %v4342_v16  ;;  %v2074_v61 = vsel %vm5501_vm11, %v2071_v52, %v2057_v49  ;;  %v2035_v16 = vsub.s32 %v2024_v40, %v2034_v10 }
 0x11a   : > { %4325 = vmatpush1.bf16.msra.mxu0 %v4324_v4  ;;  %1341 = vmatprep.mubr.f32.mxu0 %v5017_v11  ;;  %vm5511_vm13 = vcmp.lt.s32.totalorder %v2074_v61, 16 }
 0x11b   : > { %4331 = vmatprep.subr.bf16.mxu0 %v4330_v22  ;;  %4208 = vmatprep.mubr.msk.f32.mxu1 %vm352_vm0, %v1810_v25  ;;  %vm2060_vm10 = vcmp.ne.s32.totalorder %v2035_v16, 0  ;;  %vm2063_vm11 = vcmp.lt.s32.totalorder %v2035_v16, 0  ;;  %v2069_v20 = vadd.s32 18, %v2035_v16 }
 0x11c   : > { %v2004_v58 = vpop.permute.xlu0 %2003  ;;  %vm2066_vm12 = vmand %vm2063_vm11, %vm2060_vm10  ;;  %vm2120_vm10 = vcmask 1047704  }
 0x11d   : > { %4021 = vmatmul.mubr.msk.f32.gmra.mrb[2].mxu0 %vm352_vm0, %v5413_v46  ;;  %v5495_v46 = vmul.u32.u64.low 3817748708, %v2025_v44  ;;  %v5496_v47 = vmul.u32.u64.high 3817748708, %v2025_v44, %v5495_v46  ;;  %v2009_v48 = vpop.permute.xlu1 %2008  ;;  %v2072_v24 = vsel %vm2066_vm12, %v2069_v20, %v2035_v16  ;;  %v5621_v20 = vld [vmem:[#allocation8 + $0x20] sm:$0xff] }
 0x11e   : > { %1525 = vmatprep.mubr.f32.mxu0 %v5017_v11 }
 0x11f   : > { %v2044_v54 = vshrl.u32 %v5496_v47, 4 }
 0x120   : > { %4209 = vmatmul.mubr.msk.f32.vlgmr.msra.gmra.mrb[0].mxu1 %vm352_vm0, %v1811_v30 }
 0x121   : > { %4024 = vmatmul.mubr.msk.f32.vlgmr.msra.gmra.mrb[0].mxu0 %vm352_vm0, %v5423_v56  ;;  %v2045_v59 = vmul.u32 18, %v2044_v54  ;;  %4215 = vmatprep.mubr.msk.f32.mxu1 %vm352_vm0, %v5545_v43 }
 0x122   : > { %4333 = vmatpush1.bf16.msra.mxu0 %v4332_v31  ;;  %1531 = vmatprep.mubr.f32.mxu0 %v5017_v11 }
 0x123   : > { %4339 = vmatprep.subr.bf16.mxu0 %v4338_v34  ;;  %v2046_v5 = vsub.s32 %v2025_v44, %v2045_v59 }
 0x125   : > { %4025 = vmatmul.mubr.msk.f32.gmra.mrb[2].mxu0 %vm352_vm0, %v1431_v1  ;;  %vm2061_vm14 = vcmp.ne.s32.totalorder %v2046_v5, 0  ;;  %vm2064_vm15 = vcmp.lt.s32.totalorder %v2046_v5, 0 }
 0x126   : > { %1715 = vmatprep.mubr.f32.mxu0 %v5017_v11  ;;  %vm2067_vm9 = vmand %vm2064_vm15, %vm2061_vm14  ;;  %vm5528_vm14 = vcmp.lt.s32.totalorder %v2072_v24, 16  ;;  %vm2109_vm15 = vcmask 154624  }
 0x129   : > { %4028 = vmatmul.mubr.msk.f32.vlgmr.msra.gmra.mrb[0].mxu0 %vm352_vm0, %v1620_v17  ;;  %v2070_v17 = vadd.s32 18, %v2046_v5 }
 0x12a   : > { %4341 = vmatpush1.bf16.msra.mxu0 %v4340_v13  ;;  %1721 = vmatprep.mubr.f32.mxu0 %v5017_v11 }
 0x12b   : > { %v2073_v18 = vsel %vm2067_vm9, %v2070_v17, %v2046_v5  ;;  %vm2123_vm9 = vcmask 416768   ;;  %v5601_v5 = vld [vmem:[#allocation8 + $0x18] sm:$0xff] }
 0x12c   : > { %vm5521_vm8 = vcmp.lt.s32.totalorder %v2073_v18, 16 }
 0x12d   : > { %4029 = vmatmul.mubr.msk.f32.gmra.mrb[2].mxu0 %vm352_vm0, %v1621_v2 }
 0x12e   : > { %1905 = vmatprep.mubr.f32.mxu0 %v5017_v11 }
 0x131   : > { %4032 = vmatmul.mubr.msk.f32.vlgmr.msra.gmra.mrb[0].mxu0 %vm352_vm0, %v1810_v25 }
 0x132   : > { %1911 = vmatprep.mubr.f32.mxu0 %v5017_v11 }
 0x135   : > { %4033 = vmatmul.mubr.msk.f32.gmra.mrb[2].mxu0 %vm352_vm0, %v1811_v30 }
 0x136   : > { %2237 = vmatprep.mubr.f32.mxu0 %v5017_v11 }
 0x1c8   : > { %v4154_v37 = vpop.f32.mrb[4].mxu0 }
 0x1c9   : > { %v502_v38 = vpop.f32.mrb[5].mxu0 }
 0x1f3   : > { %v4210_v55 = vpop.f32.mrb[0].mxu1 }
 0x1f4   : > { %v4418_v56 = vadd.f32 %v4210_v55, %v4154_v37  ;;  %v1984_v57 = vpop.f32.mrb[1].mxu1 }
 0x1f5   : > { %v4419_v60 = vadd.f32 %v1984_v57, %v502_v38 }
 0x1f6   : > { %v2016_v62 = vadd.f32 %v4418_v56, %v2009_v48  ;;  %v3807_v56 = vld [vmem:[%s5866_s4 + $0x8] sm:$0xff] }
 0x1f7   : > { %v2013_v63 = vadd.f32 %v4419_v60, %v2004_v58 }
 0x1f8   : > { %v2022_v9 = vmax.f32 %v2016_v62, 0.0 }
 0x1f9   : > { %v2019_v3 = vmax.f32 %v2013_v63, 0.0 }
 0x1fa   : > { %v2090_v12 = vsel %vm5511_vm13, %v2022_v9, 0.0 }
 0x1fb   : > { %v2087_v6 = vsel %vm5511_vm13, %v2019_v3, 0.0 }
 0x1fc   : > { %2101 = vrot.lane.b32.xlu0 %v2087_v6, %s5025_s12  ;;  %v5603_v6 = vld [vmem:[#allocation8] sm:$0xff] }
 0x200   : > { %2107 = vrot.lane.b32.xlu0 %v2090_v12, %s5025_s12 }
 0x204   : > { %v1907_v7 = vpop.f32.mrb[0].mxu0 }
 0x205   : > { %v1909_v19 = vpop.f32.mrb[1].mxu0  ;;  %v2011_v25 = vadd.f32 %v2004_v58, %v1907_v7 }
 0x206   : > { %v2012_v2 = vadd.f32 %v2004_v58, %v1909_v19  ;;  %v5619_v19 = vld [vmem:[#allocation8 + $0x8] sm:$0xff] }
 0x207   : > { %v2017_v31 = vmax.f32 %v2011_v25, 0.0 }
 0x208   : > { %v2018_v15 = vmax.f32 %v2012_v2, 0.0  ;;  %v1913_v21 = vpop.f32.mrb[2].mxu0 }
 0x209   : > { %v2014_v22 = vadd.f32 %v2009_v48, %v1913_v21  ;;  %v1915_v23 = vpop.f32.mrb[3].mxu0  ;;  %v2085_v33 = vsel %vm5528_vm14, %v2017_v31, 0.0 }
 0x20a   : > { %v2015_v26 = vadd.f32 %v2009_v48, %v1915_v23  ;;  %v2086_v8 = vsel %vm5521_vm8, %v2018_v15, 0.0  ;;  %v3806_v48 = vld [vmem:[%s5866_s4] sm:$0xff] }
 0x20b   : > { %v2020_v27 = vmax.f32 %v2014_v22, 0.0  ;;  %2099 = vrot.lane.b32.xlu1 %v2086_v8, %s5025_s12 }
 0x20c   : > { %v2021_v28 = vmax.f32 %v2015_v26, 0.0 }
 0x20d   : > { %v2088_v30 = vsel %vm5528_vm14, %v2020_v27, 0.0 }
 0x20e   : > { %2103 = vrot.lane.b32.xlu0 %v2088_v30, %s5025_s12  ;;  %v2089_v32 = vsel %vm5521_vm8, %v2021_v28, 0.0  ;;  %v5639_v30 = vld [vmem:[#allocation8 + $0x28] sm:$0xff] }
 0x20f   : > { %2105 = vrot.lane.b32.xlu1 %v2089_v32, %s5025_s12 }
 0x213   : > { %2097 = vrot.lane.b32.xlu1 %v2085_v33, %s5025_s12  ;;  %s4940_s12 = sshll.u32 %s5026_s14, 4  ;;  %s4941_s12 = int_to_ptr.vmem [resolvable:$false] %s4940_s12 }
 0x26e   : > { %v2102_v34 = vpop.permute.xlu0 %2101 }
 0x272   : > { %v2108_v35 = vpop.permute.xlu0 %2107 }
 0x27d   : > { %v2100_v36 = vpop.permute.xlu1 %2099 }
 0x27e   : > { %v2111_v13 = vsel %vm2109_vm15, %v2100_v36, %v2102_v34 }
 0x27f   : > { %2124 = vst.msk [vmem:[#allocation2 + $0x10] sm:$0xff] %vm2123_vm9, %v2111_v13 }
 0x280   : > { %v2104_v37 = vpop.permute.xlu0 %2103 }
 0x281   : > { %2125 = vst.msk [vmem:[#allocation2 + $0x18] sm:$0xff] %vm2120_vm10, %v2104_v37  ;;  %v2106_v38 = vpop.permute.xlu1 %2105 }
 0x282   : > { %v5541_v39 = vsel %vm2109_vm15, %v2104_v37, %v2106_v38  ;;  %v2113_v40 = vsel %vm2109_vm15, %v2106_v38, %v2108_v35 }
 0x283   : > { %2127 = vst.msk [vmem:[#allocation2 + $0x28] sm:$0xff] %vm2123_vm9, %v2113_v40 }
 0x285   : > { %v2098_v41 = vpop.permute.xlu1 %2097 }
 0x286   : > { %v5543_v42 = vsel %vm2109_vm15, %v2098_v41, %v2100_v36  ;;  %2121 = vst.msk [vmem:[#allocation2] sm:$0xff] %vm2120_vm10, %v2098_v41  ;;  %v2130_v44 = vld [vmem:[#allocation2 + $0x10] sm:$0xff] }
 0x287   : > { %v4354_v14 = vpack.c.bf16 %v5541_v39, %v5543_v42  ;;  %v4740_v50 = vpack.i.bf16 %v2130_v44, %v5543_v42  ;;  %v4790_v55 = vpack.i.bf16 %v5541_v39, %v5543_v42  ;;  %v2862_v42 = vld [vmem:[#allocation8 + $0x40] sm:$0xff] }
 0x288   : > { %v5556_v51 = vld [vmem:[#allocation2 + $0x18] sm:$0xff] }
 0x28a   : > { %v2133_v45 = vld [vmem:[#allocation2 + $0x28] sm:$0xff] }
 0x28b   : > { %v4735_v46 = vpack.i.bf16 %v2133_v45, %v2130_v44  ;;  %v4358_v47 = vpack.c.bf16 %v2133_v45, %v2130_v44  ;;  %v4750_v53 = vpack.i.bf16 %v2133_v45, %v5541_v39  ;;  %v5649_v45 = vld [vmem:[#allocation8 + $0x30] sm:$0xff] }
 0x28d   : > { %4736 = vrot.lane.b32.xlu0 %v4735_v46, %s5016_s29  ;;  %4731 = vrot.lane.b32.xlu1 %v4735_v46, %s5015_s27  ;;  %v5553_v49 = vld [vmem:[#allocation2] sm:$0xff] }
 0x28e   : > { %v4356_v52 = vpack.c.bf16 %v5556_v51, %v5553_v49  ;;  %v4755_v54 = vpack.i.bf16 %v5556_v51, %v5553_v49 }
 0x291   : > { %4746 = vrot.lane.b32.xlu1 %v4735_v46, %s5018_s19  ;;  %4741 = vrot.lane.b32.xlu0 %v4740_v50, %s5019_s15 }
 0x295   : > { %4751 = vrot.lane.b32.xlu1 %v4750_v53, %s5019_s15  ;;  %4756 = vrot.lane.b32.xlu0 %v4755_v54, %s5019_s15 }
 0x299   : > { %4761 = vrot.lane.b32.xlu1 %v4740_v50, %s5020_s7  ;;  %4766 = vrot.lane.b32.xlu0 %v4750_v53, %s5020_s7 }
 0x29d   : > { %4771 = vrot.lane.b32.xlu1 %v4755_v54, %s5020_s7  ;;  %4776 = vrot.lane.b32.xlu0 %v4740_v50, %s5021_s17 }
 0x2a1   : > { %4781 = vrot.lane.b32.xlu1 %v4750_v53, %s5021_s17  ;;  %4791 = vrot.lane.b32.xlu0 %v4790_v55, %s5015_s27 }
 0x2a5   : > { %4786 = vrot.lane.b32.xlu1 %v4755_v54, %s5021_s17  ;;  %4796 = vrot.lane.b32.xlu0 %v4755_v54, %s5015_s27  ;;  %s4942_s27 = scalar_lea.vmem %s4941_s12, 1536 }
 0x2a9   : > { %4801 = vrot.lane.b32.xlu1 %v4740_v50, %s5022_s13  ;;  %4816 = vrot.lane.b32.xlu0 %v4750_v53, %s5022_s13 }
 0x2ad   : > { %4806 = vrot.lane.b32.xlu1 %v4755_v54, %s5022_s13  ;;  %4821 = vrot.lane.b32.xlu0 %v4790_v55, %s5016_s29 }
 0x2b1   : > { %4811 = vrot.lane.b32.xlu1 %v4755_v54, %s5016_s29  ;;  %4826 = vrot.lane.b32.xlu0 %v4740_v50, %s5023_s16  ;;  %s5786_s29 = scalar_lea.vmem [#allocation9], %s4516_s20 }
 0x2b2   : > { %s3869_s20 = sshll.u32 %s5786_s29, 4  ;;  %s5807_s20 = int_to_ptr.vmem [resolvable:$true] %s3869_s20 }
 0x2b3   : > { %s4936_s30 = scalar_lea.vmem %s5807_s20, 768  ;;  %p4943_p7 = scmp.lt.s32.totalorder %s5807_s20, %s4941_s12 }
 0x2b4   : > { %p4937_p11 = scmp.ne.s32.totalorder %s5807_s20, %s4936_s30  ;;  %p4944_p9 = scmp.lt.s32.totalorder %s4942_s27, %s4936_s30 }
 0x2b5   : > { %4831 = vrot.lane.b32.xlu1 %v4750_v53, %s5023_s16  ;;  %4841 = vrot.lane.b32.xlu0 %v4790_v55, %s5018_s19 }
 0x2b6   : > { %p4938_p1 = pnand %p4937_p11, %p5895_p0  ;;  %p4945_p12 = por %p4944_p9, %p4943_p7 }
 0x2b8   : > { %p4939_p3 = pneg %p4938_p1 }
 0x2b9   : > { %4836 = vrot.lane.b32.xlu1 %v4755_v54, %s5023_s16  ;;  %4846 = vrot.lane.b32.xlu0 %v4755_v54, %s5018_s19  ;;  %s4523_s19 = smul.u32 768, %s5085_s25 }
 0x2ba   : > { %p4946_p2 = pnand %p4945_p12, %p4939_p3 }
 0x2bb   : > { %s5813_s8 = scalar_lea.hbm %s5867_s5, %s4523_s19 }
 0x2bd   : > { %3810 = vperm.xlu1 %4729, %v3806_v48   ;;  %3815 = vperm.xlu0 %4728, %v3807_v56  }
 0x2ff   : > { %v5593_v57 = vpop.permute.xlu0 %4736  ;;  %v4732_v58 = vpop.permute.xlu1 %4731 }
 0x300   : > { %v4734_v60 = vunpack.i.h.bf16 %v4732_v58  ;;  %v4733_v61 = vunpack.i.l.bf16 %v4732_v58  ;;  %v4739_v0 = vunpack.i.h.bf16 %v5593_v57  ;;  %v4738_v3 = vunpack.i.l.bf16 %v5593_v57 }
 0x302   : > { %v4350_v59 = vpack.c.bf16 %v4734_v60, %v4733_v61  ;;  %v4366_v12 = vpack.c.bf16 %v4739_v0, %v4738_v3 }
 0x303   : > { %v5595_v62 = vpop.permute.xlu0 %4741  ;;  %v5597_v63 = vpop.permute.xlu1 %4746 }
 0x304   : > { %4351 = vmatprep.subr.bf16.mxu1 %v4350_v59  ;;  %v4749_v7 = vunpack.i.h.bf16 %v5597_v63  ;;  %v4748_v18 = vunpack.i.l.bf16 %v5597_v63  ;;  %v4744_v24 = vunpack.i.h.bf16 %v5595_v62  ;;  %v4743_v25 = vunpack.i.l.bf16 %v5595_v62  ;;  %v3051_v63 = vld [vmem:[#allocation8 + $0x50] sm:$0xff] }
 0x305   : > { %4353 = vmatpush3.bf16.msra.mxu1 %v4350_v59  ;;  %v5665_v59 = vld [vmem:[#allocation8 + $0x38] sm:$0xff] }
 0x306   : > { %4359 = vmatprep.subr.bf16.mxu1 %v4358_v47  ;;  %v4374_v21 = vpack.c.bf16 %v4749_v7, %v4748_v18  ;;  %v2877_v38 = vsel %vm1064_vm4, %v4743_v25, %v4744_v24 }
 0x307   : > { %v4757_v9 = vpop.permute.xlu0 %4756  ;;  %v4752_v10 = vpop.permute.xlu1 %4751 }
 0x308   : > { %4216 = vmatmul.mubr.msk.f32.vlgmr.msra.gmra.mrb[2].mxu1 %vm352_vm0, %v5601_v5  ;;  %v4754_v22 = vunpack.i.h.bf16 %v4752_v10  ;;  %v4753_v23 = vunpack.i.l.bf16 %v4752_v10  ;;  %v4759_v34 = vunpack.i.h.bf16 %v4757_v9  ;;  %v4758_v35 = vunpack.i.l.bf16 %v4757_v9 }
 0x309   : > { %4361 = vmatpush3.bf16.msra.mxu1 %v4358_v47  ;;  %4222 = vmatprep.mubr.msk.f32.mxu1 %vm352_vm0, %v5603_v6 }
 0x30a   : > { %4367 = vmatprep.subr.bf16.mxu1 %v4366_v12  ;;  %v2879_v31 = vsel %vm1064_vm4, %v4753_v23, %v4754_v22  ;;  %v2876_v50 = vsel %vm1064_vm4, %v4758_v35, %v4743_v25  ;;  %v2878_v53 = vsel %vm1064_vm4, %v4759_v34, %v4753_v23  ;;  %v4382_v62 = vpack.c.bf16 %v4754_v22, %v4744_v24 }
 0x30b   : > { %v5613_v16 = vpop.permute.xlu0 %4766  ;;  %v5615_v17 = vpop.permute.xlu1 %4761  ;;  %v4378_v44 = vpack.c.bf16 %v2879_v31, %v2877_v38  ;;  %v4380_v9 = vpack.c.bf16 %v2878_v53, %v2876_v50 }
 0x30c   : > { %v4769_v56 = vunpack.i.h.bf16 %v5613_v16  ;;  %v4768_v58 = vunpack.i.l.bf16 %v5613_v16 }
 0x30e   : > { %v3068_v39 = vsel %vm1254_vm5, %v4768_v58, %v4769_v56 }
 0x30f   : > { %v5623_v2 = vpop.permute.xlu0 %4776  ;;  %v5625_v15 = vpop.permute.xlu1 %4771 }
 0x310   : > { %4223 = vmatmul.mubr.msk.f32.vlgmr.msra.gmra.mrb[2].mxu1 %vm352_vm0, %v5619_v19  ;;  %v4774_v49 = vunpack.i.h.bf16 %v5625_v15  ;;  %v4773_v51 = vunpack.i.l.bf16 %v5625_v15  ;;  %v4779_v38 = vunpack.i.h.bf16 %v5623_v2 }
 0x311   : > { %4369 = vmatpush3.bf16.msra.mxu1 %v4366_v12  ;;  %4229 = vmatprep.mubr.msk.f32.mxu1 %vm352_vm0, %v5621_v20 }
 0x312   : > { %4375 = vmatprep.subr.bf16.mxu1 %v4374_v21  ;;  %v3067_v31 = vsel %vm1254_vm5, %v4774_v49, %v4768_v58 }
 0x313   : > { %v4792_v26 = vpop.permute.xlu0 %4791  ;;  %v5637_v8 = vpop.permute.xlu1 %4781 }
 0x314   : > { %v4794_v27 = vunpack.i.h.bf16 %v4792_v26  ;;  %v4793_v28 = vunpack.i.l.bf16 %v4792_v26  ;;  %v4784_v34 = vunpack.i.h.bf16 %v5637_v8  ;;  %v4783_v35 = vunpack.i.l.bf16 %v5637_v8 }
 0x316   : > { %v2158_v32 = vsel %vm341_vm1, %v4793_v28, %v4733_v61  ;;  %v2160_v33 = vsel %vm341_vm1, %v4794_v27, %v4734_v60  ;;  %v4764_v60 = vunpack.i.h.bf16 %v5615_v17  ;;  %v4763_v61 = vunpack.i.l.bf16 %v5615_v17 }
 0x317   : > { %v4797_v36 = vpop.permute.xlu0 %4796  ;;  %v5644_v13 = vpop.permute.xlu1 %4786  ;;  %v4346_v37 = vpack.c.bf16 %v2160_v33, %v2158_v32 }
 0x318   : > { %v4799_v40 = vunpack.i.h.bf16 %v4797_v36  ;;  %v4798_v41 = vunpack.i.l.bf16 %v4797_v36  ;;  %4230 = vmatmul.mubr.msk.f32.vlgmr.msra.gmra.mrb[2].mxu1 %vm352_vm0, %v5639_v30  ;;  %v3066_v17 = vsel %vm1254_vm5, %v4763_v61, %v4764_v60  ;;  %v3065_v32 = vsel %vm1254_vm5, %v4773_v51, %v4763_v61 }
 0x319   : > { %4377 = vmatpush3.bf16.msra.mxu1 %v4374_v21  ;;  %4347 = vmatprep.subr.bf16.mxu0 %v4346_v37  ;;  %v4386_v25 = vpack.c.bf16 %v3068_v39, %v3066_v17  ;;  %v4789_v53 = vunpack.i.h.bf16 %v5644_v13 }
 0x31a   : > { %v2157_v46 = vsel %vm341_vm1, %v4798_v41, %v4793_v28  ;;  %v2159_v47 = vsel %vm341_vm1, %v4799_v40, %v4794_v27  ;;  %4379 = vmatprep.subr.bf16.mxu1 %v4378_v44  ;;  %4236 = vmatprep.mubr.msk.f32.mxu1 %vm352_vm0, %v5649_v45  ;;  %v2863_v27 = vld [vmem:[#allocation8 + $0x48] sm:$0xff]  ;;  %v4388_v40 = vpack.c.bf16 %v3067_v31, %v3065_v32  ;;  %vm5891_vm1 = vcmask 736256  }
 0x31b   : > { %v4348_v54 = vpack.c.bf16 %v2159_v47, %v2157_v46  ;;  %v5655_v55 = vpop.permute.xlu0 %4816  ;;  %v5657_v48 = vpop.permute.xlu1 %4801  ;;  %v4390_v44 = vpack.c.bf16 %v4769_v56, %v4764_v60  ;;  %v3052_v56 = vld [vmem:[#allocation8 + $0x58] sm:$0xff]  ;;  %v3256_v60 = vsel %vm1444_vm6, %v4789_v53, %v4783_v35  ;;  %vm5894_vm4 = vmmov %vm5891_vm1 }
 0x31c   : > { %v4804_v61 = vunpack.i.h.bf16 %v5657_v48 }
 0x31d   : > { %4349 = vmatpush1.bf16.msra.mxu0 %v4348_v54 }
 0x31e   : > { %4355 = vmatprep.subr.bf16.mxu0 %v4354_v14 }
 0x31f   : > { %v4822_v10 = vpop.permute.xlu0 %4821  ;;  %v5670_v12 = vpop.permute.xlu1 %4806 }
 0x320   : > { %v4824_v21 = vunpack.i.h.bf16 %v4822_v10  ;;  %v4823_v23 = vunpack.i.l.bf16 %v4822_v10  ;;  %4237 = vmatmul.mubr.msk.f32.vlgmr.msra.gmra.mrb[2].mxu1 %vm352_vm0, %v5665_v59  ;;  %4036 = vmatmul.mubr.msk.f32.vlgmr.msra.gmra.mrb[6].mxu0 %vm352_vm0, %v5545_v43  ;;  %v4398_v10 = vpack.c.bf16 %v4784_v34, %v4779_v38 }
 0x321   : > { %4381 = vmatpush1.bf16.msra.mxu1 %v4380_v9  ;;  %4357 = vmatpush1.bf16.msra.mxu0 %v4356_v52 }
 0x322   : > { %4383 = vmatprep.subr.bf16.mxu1 %v4382_v62  ;;  %2956 = vmatprep.mubr.f32.mxu1 %v5017_v11  ;;  %v2499_v14 = vsel %vm684_vm2, %v4823_v23, %v4738_v3  ;;  %v2501_v24 = vsel %vm684_vm2, %v4824_v21, %v4739_v0 }
 0x323   : > { %v5687_v43 = vpop.permute.xlu0 %4826  ;;  %v4812_v22 = vpop.permute.xlu1 %4811  ;;  %2243 = vmatprep.mubr.f32.mxu0 %v5017_v11  ;;  %v4362_v3 = vpack.c.bf16 %v2501_v24, %v2499_v14 }
 0x324   : > { %v4814_v52 = vunpack.i.h.bf16 %v4812_v22  ;;  %v4813_v26 = vunpack.i.l.bf16 %v4812_v22  ;;  %4052 = vmatmul.mubr.msk.f32.vlgmr.msra.gmra.mrb[4].mxu1 %vm352_vm0, %v2862_v42  ;;  %4037 = vmatmul.mubr.msk.f32.gmra.mrb[8].mxu0 %vm352_vm0, %v5601_v5 }
 0x325   : > { %4385 = vmatpush3.bf16.msra.mxu1 %v4382_v62  ;;  %2962 = vmatprep.mubr.f32.mxu1 %v5017_v11  ;;  %v4803_v62 = vunpack.i.l.bf16 %v5657_v48  ;;  %v4809_v48 = vunpack.i.h.bf16 %v5670_v12 }
 0x326   : > { %v2500_v57 = vsel %vm684_vm2, %v4814_v52, %v4824_v21  ;;  %v2498_v0 = vsel %vm684_vm2, %v4813_v26, %v4823_v23  ;;  %4387 = vmatprep.subr.bf16.mxu1 %v4386_v25  ;;  %2395 = vmatprep.mubr.f32.mxu0 %v5017_v11  ;;  %v4808_v23 = vunpack.i.l.bf16 %v5670_v12  ;;  %v4829_v25 = vunpack.i.h.bf16 %v5687_v43  ;;  %v3429_v52 = vld [vmem:[#allocation8 + $0x70] sm:$0xff]  ;;  %vm5892_vm2 = vmmov %vm5891_vm1 }
 0x327   : > { %v4364_v15 = vpack.c.bf16 %v2500_v57, %v2498_v0  ;;  %4363 = vmatprep.subr.bf16.mxu0 %v4362_v3  ;;  %v4842_v28 = vpop.permute.xlu0 %4841  ;;  %v4832_v39 = vpop.permute.xlu1 %4831 }
 0x328   : > { %v4844_v5 = vunpack.i.h.bf16 %v4842_v28  ;;  %v4843_v33 = vunpack.i.l.bf16 %v4842_v28  ;;  %4053 = vmatmul.mubr.msk.f32.gmra.mrb[6].mxu1 %vm352_vm0, %v2863_v27  ;;  %4040 = vmatmul.mubr.msk.f32.vlgmr.msra.gmra.mrb[6].mxu0 %vm352_vm0, %v5603_v6  ;;  %v4778_v6 = vunpack.i.l.bf16 %v5623_v2  ;;  %v3443_v14 = vsel %vm1634_vm7, %v4808_v23, %v4803_v62 }
 0x329   : > { %4365 = vmatpush1.bf16.msra.mxu0 %v4364_v15  ;;  %4243 = vmatprep.mubr.msk.f32.mxu1 %vm352_vm0, %v2862_v42  ;;  %v4834_v22 = vunpack.i.h.bf16 %v4832_v39  ;;  %v4833_v12 = vunpack.i.l.bf16 %v4832_v39 }
 0x32a   : > { %2401 = vmatprep.mubr.f32.mxu0 %v5017_v11  ;;  %v2688_v36 = vsel %vm874_vm3, %v4843_v33, %v4748_v18  ;;  %v2690_v37 = vsel %vm874_vm3, %v4844_v5, %v4749_v7  ;;  %v3257_v7 = vsel %vm1444_vm6, %v4783_v35, %v4784_v34  ;;  %v3255_v16 = vsel %vm1444_vm6, %v4778_v6, %v4779_v38 }
 0x32b   : > { %v4847_v41 = vpop.permute.xlu0 %4846  ;;  %v4370_v8 = vpack.c.bf16 %v2690_v37, %v2688_v36  ;;  %v4394_v54 = vpack.c.bf16 %v3257_v7, %v3255_v16  ;;  %v4837_v51 = vpop.permute.xlu1 %4836  ;;  %v3635_v26 = vsel %vm5891_vm1, %v4833_v12, %v4834_v22  ;;  %v4414_v32 = vpack.c.bf16 %v4834_v22, %v4829_v25 }
 0x32c   : > { %v4849_v46 = vunpack.i.h.bf16 %v4847_v41  ;;  %v4848_v47 = vunpack.i.l.bf16 %v4847_v41  ;;  %4244 = vmatmul.mubr.msk.f32.vlgmr.msra.gmra.mrb[2].mxu1 %vm352_vm0, %v2863_v27  ;;  %4041 = vmatmul.mubr.msk.f32.gmra.mrb[8].mxu0 %vm352_vm0, %v5619_v19  ;;  %v4788_v19 = vunpack.i.l.bf16 %v5644_v13  ;;  %v4818_v13 = vunpack.i.l.bf16 %v5655_v55 }
 0x32d   : > { %4389 = vmatpush1.bf16.msra.mxu1 %v4388_v40  ;;  %4371 = vmatprep.subr.bf16.mxu0 %v4370_v8  ;;  %v4839_v27 = vunpack.i.h.bf16 %v4837_v51  ;;  %v4838_v57 = vunpack.i.l.bf16 %v4837_v51 }
 0x32e   : > { %v2687_v18 = vsel %vm874_vm3, %v4848_v47, %v4843_v33  ;;  %v2689_v2 = vsel %vm874_vm3, %v4849_v46, %v4844_v5  ;;  %4391 = vmatprep.subr.bf16.mxu1 %v4390_v44  ;;  %3145 = vmatprep.mubr.f32.mxu1 %v5017_v11  ;;  %v3254_v58 = vsel %vm1444_vm6, %v4788_v19, %v4778_v6  ;;  %vm5893_vm3 = vmmov %vm5891_vm1  ;;  %v3618_v5 = vld [vmem:[#allocation8 + $0x80] sm:$0xff]  ;;  %v3619_v33 = vld [vmem:[#allocation8 + $0x88] sm:$0xff] }
 0x32f   : > { %v4372_v50 = vpack.c.bf16 %v2689_v2, %v2687_v18  ;;  %2578 = vmatprep.mubr.f32.mxu0 %v5017_v11  ;;  %v4396_v9 = vpack.c.bf16 %v3256_v60, %v3254_v58  ;;  %v3445_v42 = vsel %vm1634_vm7, %v4809_v48, %v4818_v13  ;;  %v3634_v28 = vsel %vm5894_vm4, %v4839_v27, %v4833_v12 }
 0x330   : > { %4056 = vmatmul.mubr.msk.f32.vlgmr.msra.gmra.mrb[4].mxu1 %vm352_vm0, %v3051_v63  ;;  %4044 = vmatmul.mubr.msk.f32.vlgmr.msra.gmra.mrb[6].mxu0 %vm352_vm0, %v5621_v20  ;;  %v4819_v20 = vunpack.i.h.bf16 %v5655_v55  ;;  %v3444_v55 = vsel %vm1634_vm7, %v4803_v62, %v4804_v61  ;;  %v4404_v24 = vpack.c.bf16 %v3445_v42, %v3443_v14 }
 0x331   : > { %4393 = vmatpush3.bf16.msra.mxu1 %v4390_v44  ;;  %4373 = vmatpush1.bf16.msra.mxu0 %v4372_v50 }
 0x332   : > { %4395 = vmatprep.subr.bf16.mxu1 %v4394_v54  ;;  %3151 = vmatprep.mubr.f32.mxu1 %v5017_v11  ;;  %v3446_v21 = vsel %vm1634_vm7, %v4818_v13, %v4819_v20  ;;  %v4406_v49 = vpack.c.bf16 %v4819_v20, %v4804_v61 }
 0x333   : > { %2584 = vmatprep.mubr.f32.mxu0 %v5017_v11  ;;  %v4402_v17 = vpack.c.bf16 %v3446_v21, %v3444_v55 }
 0x334   : > { %4057 = vmatmul.mubr.msk.f32.gmra.mrb[6].mxu1 %vm352_vm0, %v3052_v56  ;;  %4045 = vmatmul.mubr.msk.f32.gmra.mrb[8].mxu0 %vm352_vm0, %v5639_v30  ;;  %v3240_v30 = vld [vmem:[#allocation8 + $0x60] sm:$0xff] }
 0x335   : > { %4250 = vmatprep.mubr.msk.f32.mxu1 %vm352_vm0, %v3051_v63  ;;  %2767 = vmatprep.mubr.f32.mxu0 %v5017_v11 }
 0x338   : > { %4251 = vmatmul.mubr.msk.f32.vlgmr.msra.gmra.mrb[2].mxu1 %vm352_vm0, %v3052_v56  ;;  %4048 = vmatmul.mubr.msk.f32.vlgmr.msra.gmra.mrb[6].mxu0 %vm352_vm0, %v5649_v45  ;;  %v3241_v45 = vld [vmem:[#allocation8 + $0x68] sm:$0xff] }
 0x339   : > { %4397 = vmatpush1.bf16.msra.mxu1 %v4396_v9  ;;  %3334 = vmatprep.mubr.f32.mxu1 %v5017_v11 }
 0x33a   : > { %4399 = vmatprep.subr.bf16.mxu1 %v4398_v10  ;;  %2773 = vmatprep.mubr.f32.mxu0 %v5017_v11 }
 0x33c   : > { %4060 = vmatmul.mubr.msk.f32.vlgmr.msra.gmra.mrb[4].mxu1 %vm352_vm0, %v3240_v30  ;;  %4049 = vmatmul.mubr.msk.f32.gmra.mrb[8].mxu0 %vm352_vm0, %v5665_v59  ;;  %v4828_v59 = vunpack.i.l.bf16 %v5687_v43  ;;  %v3430_v43 = vld [vmem:[#allocation8 + $0x78] sm:$0xff]  ;;  %v3811_v41 = vpop.permute.xlu1 %3810  ;;  %v3816_v18 = vpop.permute.xlu0 %3815 }
 0x33d   : > { %4401 = vmatpush3.bf16.msra.mxu1 %v4398_v10  ;;  %3340 = vmatprep.mubr.f32.mxu1 %v5017_v11 }
 0x33e   : > { %4403 = vmatprep.subr.bf16.mxu1 %v4402_v17  ;;  %v3633_v3 = vsel %vm5892_vm2, %v4828_v59, %v4829_v25  ;;  %v3632_v15 = vsel %vm5893_vm3, %v4838_v57, %v4828_v59 }
 0x33f   : > { %v4410_v0 = vpack.c.bf16 %v3635_v26, %v3633_v3  ;;  %v4412_v31 = vpack.c.bf16 %v3634_v28, %v3632_v15 }
 0x340   : > { %4061 = vmatmul.mubr.msk.f32.gmra.mrb[6].mxu1 %vm352_vm0, %v3241_v45 }
 0x341   : > { %4257 = vmatprep.mubr.msk.f32.mxu1 %vm352_vm0, %v3240_v30 }
 0x344   : > { %4258 = vmatmul.mubr.msk.f32.vlgmr.msra.gmra.mrb[2].mxu1 %vm352_vm0, %v3241_v45 }
 0x345   : > { %4405 = vmatpush1.bf16.msra.mxu1 %v4404_v24  ;;  %3523 = vmatprep.mubr.f32.mxu1 %v5017_v11 }
 0x346   : > { %4407 = vmatprep.subr.bf16.mxu1 %v4406_v49 }
 0x348   : > { %4064 = vmatmul.mubr.msk.f32.vlgmr.msra.gmra.mrb[4].mxu1 %vm352_vm0, %v3429_v52 }
 0x349   : > { %4409 = vmatpush3.bf16.msra.mxu1 %v4406_v49  ;;  %3529 = vmatprep.mubr.f32.mxu1 %v5017_v11 }
 0x34a   : > { %4411 = vmatprep.subr.bf16.mxu1 %v4410_v0 }
 0x34c   : > { %4065 = vmatmul.mubr.msk.f32.gmra.mrb[6].mxu1 %vm352_vm0, %v3430_v43 }
 0x34d   : > { %4264 = vmatprep.mubr.msk.f32.mxu1 %vm352_vm0, %v3429_v52 }
 0x350   : > { %4265 = vmatmul.mubr.msk.f32.vlgmr.msra.gmra.mrb[2].mxu1 %vm352_vm0, %v3430_v43 }
 0x351   : > { %4413 = vmatpush1.bf16.msra.mxu1 %v4412_v31  ;;  %3712 = vmatprep.mubr.f32.mxu1 %v5017_v11 }
 0x352   : > { %4415 = vmatprep.subr.bf16.mxu1 %v4414_v32 }
 0x354   : > { %4068 = vmatmul.mubr.msk.f32.vlgmr.msra.gmra.mrb[4].mxu1 %vm352_vm0, %v3618_v5 }
 0x355   : > { %4417 = vmatpush3.bf16.msra.mxu1 %v4414_v32  ;;  %3718 = vmatprep.mubr.f32.mxu1 %v5017_v11 }
 0x358   : > { %4069 = vmatmul.mubr.msk.f32.gmra.mrb[6].mxu1 %vm352_vm0, %v3619_v33 }
 0x359   : > { %4271 = vmatprep.mubr.msk.f32.mxu1 %vm352_vm0, %v3618_v5 }
 0x35c   : > { %4272 = vmatmul.mubr.msk.f32.vlgmr.msra.gmra.mrb[2].mxu1 %vm352_vm0, %v3619_v33  ;;  %vm3826_vm0 = vcmask 261120  }
 0x40b   : > { %v2769_v34 = vpop.f32.mrb[6].mxu0 }
 0x40c   : > { %v2771_v35 = vpop.f32.mrb[7].mxu0 }
 0x40f   : > { %v2775_v36 = vpop.f32.mrb[8].mxu0 }
 0x410   : > { %v2777_v37 = vpop.f32.mrb[9].mxu0 }
 0x427   : > { %v3714_v38 = vpop.f32.mrb[4].mxu1 }
 0x428   : > { %v4420_v6 = vadd.f32 %v3714_v38, %v2769_v34  ;;  %v3716_v40 = vpop.f32.mrb[5].mxu1 }
 0x429   : > { %v4421_v8 = vadd.f32 %v3716_v40, %v2771_v35 }
 0x42a   : > { %v3818_v44 = vadd.f32 %v4420_v6, %v3811_v41 }
 0x42b   : > { %v3819_v46 = vadd.f32 %v4421_v8, %v3811_v41  ;;  %v3720_v11 = vpop.f32.mrb[6].mxu1 }
 0x42c   : > { %3824 = vst [vmem:[%s5786_s29] sm:$0xff] %v3818_v44  ;;  %v4422_v47 = vadd.f32 %v3720_v11, %v2775_v36  ;;  %v3722_v63 = vpop.f32.mrb[7].mxu1  ;;  %v3831_v7 = vsel %vm5528_vm14, %v3818_v44, 0.0 }
 0x42d   : > { %3825 = vst [vmem:[%s5786_s29 + $0x8] sm:$0xff] %v3819_v46  ;;  %v4423_v2 = vadd.f32 %v3722_v63, %v2777_v37  ;;  %v3832_v50 = vsel %vm5521_vm8, %v3819_v46, 0.0 }
 0x42e   : > { %v3821_v16 = vadd.f32 %v4422_v47, %v3816_v18  ;;  %v3837_v53 = vadd.f32 %v3832_v50, %v3831_v7 }
 0x42f   : > { %v3822_v19 = vadd.f32 %v4423_v2, %v3816_v18  ;;  %v4273_v54 = vpop.f32.mrb[2].mxu1 }
 0x430   : > { %3828 = vst [vmem:[%s5786_s29 + $0x18] sm:$0xff] %v3821_v16  ;;  %v3823_v56 = vadd.f32 %v4273_v54, %v3816_v18  ;;  %v3791_v58 = vpop.f32.mrb[3].mxu1  ;;  %v3834_v60 = vsel %vm5528_vm14, %v3821_v16, 0.0 }
 0x431   : > { %3829 = vst [vmem:[%s5786_s29 + $0x20] sm:$0xff] %v3822_v19  ;;  %v3820_v20 = vadd.f32 %v3811_v41, %v3791_v58  ;;  %v3835_v13 = vsel %vm5521_vm8, %v3822_v19, 0.0 }
 0x432   : > { %v3836_v61 = vsel %vm5511_vm13, %v3823_v56, 0.0  ;;  %3830 = vst.msk [vmem:[%s5786_s29 + $0x28] sm:$0xff] %vm3826_vm0, %v3823_v56  ;;  %v3842_v62 = vadd.f32 %v3835_v13, %v3834_v60 }
 0x433   : > { %v3833_v9 = vsel %vm5511_vm13, %v3820_v20, 0.0  ;;  %3827 = vst.msk [vmem:[%s5786_s29 + $0x10] sm:$0xff] %vm3826_vm0, %v3820_v20  ;;  %v3843_v29 = vsel %vm3826_vm0, %v3836_v61, 0.0 }
 0x434   : > { %v3844_v10 = vadd.f32 %v3843_v29, %v3842_v62  ;;  %v3838_v30 = vsel %vm3826_vm0, %v3833_v9, 0.0 }
 0x435   : > { %v3839_v55 = vadd.f32 %v3838_v30, %v3837_v53 }
 0x436   : > { %3845 = vadd.xlane.f32.xlu0 %v3844_v10 }
 0x437   : > { %3840 = vadd.xlane.f32.xlu1 %v3839_v55 }
 0x438   : > { %4949 = shalt.err (!%p4946_p2)
}
 0x439   : > { %s4950_s15 = scalar_lea.hbm %s5813_s8, 768  ;;  %s4954_s29 = scalar_lea.hbm %s5867_s5, 1536 }
 0x43a   : > { %p4951_p13 = scmp.ne.s32.totalorder %s5813_s8, %s4950_s15  ;;  %p4955_p4 = scmp.lt.u32.totalorder %s5813_s8, %s5867_s5 }
 0x43b   : > { %p4956_p5 = scmp.lt.u32.totalorder %s4954_s29, %s4950_s15  ;;  %p4958_p11 = scmp.lt.u32.totalorder %s4950_s15, %s5813_s8 }
 0x43c   : > { %p4952_p6 = pnand %p4951_p13, %p5895_p0 }
 0x43d   : > { %p4957_p8 = por %p4956_p5, %p4955_p4 }
 0x43e   : > { %p4953_p10 = pneg %p4952_p6 }
 0x43f   : > { %p4959_p1 = por %p4958_p11, %p4957_p8 }
 0x441   : > { %p4960_p3 = pnand %p4959_p1, %p4953_p10 }
 0x443   : > { %4963 = shalt.err (!%p4960_p3)
}
 0x444   : > { %s5027_s16 = smov 384   ;;  %s5028_s30 = smov 24   ;;  %vm3847_vm5 = vcmask 7168  }
 0x445   : > { %4534 = dma.vmem_to_hbm [thread:$0]  (%p5895_p0), %s5807_s20, 768, %s5813_s8, %s3851_s18, %s5027_s16, %s5027_s16, %s5028_s30  }
 0x446   : > { %p307_p7 = scmp.lt.s32.totalorder %s5085_s25, 1 }
 0x448   : > { %s5903_s25 = smov (!%p307_p7, %s5085_s25), 1 }
 0x449   : > { %s4075_s14 = sshll.u32 %s5903_s25, 4 }
 0x44a   : > { %s311_s15 = scalar_lea.vmem %s5868_s6, %s4075_s14 }
 0x4c3   : > { %v3846_v1 = vpop.xlane.xlu0 %3845 }
 0x4c4   : > { %3849 = vst.msk [vmem:[%s311_s15 + $0x8] sm:$0xff] %vm3847_vm5, %v3846_v1  ;;  %v3841_v4 = vpop.xlane.xlu1 %3840 }
 0x4c5   : > { %3848 = vst.msk [vmem:[%s311_s15] sm:$0xff] %vm3847_vm5, %v3841_v4 }
 0x4c6 PF: > { %s3887_s7 = sand.u32 1, %s4994_s21   ;;  %p5896_p9 = scmp.ne.s32.totalorder %s5874_s28, 0 }
 0x4c7   : > { %p5897_p12 = scmp.ge.s32.totalorder %s5006_s24, 2  ;;  %s3888_s9 = scalar_lea.sflag [#allocation5], %s3887_s7 }
 0x4c9   : > { %p4548_p0 = pnand %p5897_p12, %p5896_p9 }
 0x4cb   : > { %4989 = dma.done.wait (!%p4548_p0), %s3888_s9, 768  }
 0x4cc   : > { %4991 = vsyncadd (!%p4548_p0), %s3888_s9, 4294966528  ;;  %p21_p2 = scmp.ge.s32.totalorder %s5174_s26, 4   ;;  %s5898_s21 = smov %s4998_s22 }
 0x4cd   : > { %s5899_s22 = smov %s5002_s23  ;;  %s5900_s23 = smov %s5190_s11 }
 0x4ce   : > { %s5901_s24 = smov %s5174_s26  ;;  %23 = sbr.rel (!%p21_p2) target bundleno = 6 (0x6), region = 121 }
 0x4d5   :  { %3901 = vsyncpa [#allocation4], 1 }
 0x4d6   :  { %3903 = vsyncpa [#allocation4 + $0x1], 1 }
 0x4d7   :  { %3904 = vsyncpa [#allocation7], 1 }
 0x4d8   :  { %3905 = vsyncpa [#allocation5], 1 }
 0x4d9   :  { %3907 = vsyncpa [#allocation5 + $0x1], 1 }

</bundles_post_ra>
